<compile_context>
chip_gen: v5e
topology: v5e:2x2
jax: 0.10.0
libtpu: 0.0.40
codegen_flags: <defaults>
</compile_context>

<pallas_src>
import functools

import jax
import jax.numpy as jnp
from jax.experimental import pallas as pl
from jax.experimental.pallas import tpu as pltpu

BN_EPS = 1e-5
LANE = 128


def _round_up(n, m):
    return ((n + m - 1) // m) * m


# ----------------------------------------------------------------------------
# Fused kernel: 3x (Conv1d + train-mode BN + ReLU) -> SE -> scale -> ReLU
#   x_ref   : (B, L, CP)      channel-padded activation (CP = 128-multiple)
#   w{i}_ref: (K*CP, CP)      im2col-flattened conv weights (tap-major rows)
#   g{i}/b{i}: (1, CP)        BN gamma / beta (padded channels have gamma=beta=0)
#   sw1/sb1 : (CP, CRP)/(1, CRP)   SE excitation layer 1
#   sw2/sb2 : (CRP, CP)/(1, CP)    SE excitation layer 2
#   out_ref : (B, L, CP)
#   pad_ref : (B, OFF + L + OFF, CP)  VMEM scratch with zero halos (the conv padding)
# ----------------------------------------------------------------------------
def cnn_block_kernel(x_ref,
                     w1_ref, g1_ref, b1_ref,
                     w2_ref, g2_ref, b2_ref,
                     w3_ref, g3_ref, b3_ref,
                     sw1_ref, sb1_ref, sw2_ref, sb2_ref,
                     out_ref,
                     pad_ref,
                     *, K, PAD, OFF):
    B, L, CP = out_ref.shape

    # Zero the haloed scratch once; the interior [OFF:OFF+L) is overwritten every
    # layer while the halo rows stay zero -> this IS the conv zero-padding.
    pad_ref[...] = jnp.zeros_like(pad_ref)

    def conv_bn_relu(h, w_ref, gamma_ref, beta_ref):
        # h: (B, L, CP) value. OFF and L are 8-aligned -> unmasked full-tile store.
        pad_ref[:, OFF:OFF + L, :] = h

        # im2col: K shifted views concatenated along lanes (128-aligned pieces)
        # -> a single MXU matmul with a K*CP-deep contraction instead of K shallow
        #    pushes.  (On v6e/v7x the matmul inputs could additionally be cast to
        #    bf16; kept f32 here for exact parity with the f32 reference.)
        taps = [pad_ref[:, OFF - PAD + k: OFF - PAD + k + L, :] for k in range(K)]
        xcol = jnp.concatenate(taps, axis=-1).reshape(B * L, K * CP)
        acc = jnp.dot(xcol, w_ref[...], preferred_element_type=jnp.float32)

        # BatchNorm1d with training-mode (biased) batch statistics over (B, L) per
        # channel, folded into one scale + shift.  Conv bias omitted: it cancels
        # exactly in (acc - mean).
        mean = jnp.mean(acc, axis=0, keepdims=True)
        var = jnp.mean((acc - mean) ** 2, axis=0, keepdims=True)
        scale = gamma_ref[...] * jax.lax.rsqrt(var + BN_EPS)   # rsqrt -> EUP slot
        shift = beta_ref[...] - scale * mean
        y = jnp.maximum(scale * acc + shift, 0.0)              # folded affine + ReLU
        return y.reshape(B, L, CP)

    h = conv_bn_relu(x_ref[...], w1_ref, g1_ref, b1_ref)
    h = conv_bn_relu(h, w2_ref, g2_ref, b2_ref)
    h = conv_bn_relu(h, w3_ref, g3_ref, b3_ref)

    # SEBlock1d: global average pool over L -> Linear -> ReLU -> Linear -> Sigmoid.
    s = jnp.mean(h, axis=1)                                     # (B, CP)
    z = jnp.dot(s, sw1_ref[...], preferred_element_type=jnp.float32) + sb1_ref[...]
    z = jnp.maximum(z, 0.0)
    g = jnp.dot(z, sw2_ref[...], preferred_element_type=jnp.float32) + sb2_ref[...]
    g = jax.nn.sigmoid(g)                                       # exp/recip -> EUP

    # Channel-wise rescale + final ReLU; lane-dense (CP=128-multiple) output store.
    out_ref[...] = jnp.maximum(h * g[:, None, :], 0.0)


# ----------------------------------------------------------------------------
# Wrapper: layout/padding of parameters and activation, single pallas_call.
# ----------------------------------------------------------------------------
@functools.partial(jax.jit, static_argnames=("kernel_size", "stride", "padding"))
def cnn_block_forward(x_ncl, params, *, kernel_size=3, stride=1, padding=1):
    if stride != 1:
        # TODO(synk): stride > 1 would need strided tap gathering in the kernel.
        raise NotImplementedError("only stride=1 is implemented")

    B, Cin, L = x_ncl.shape
    C = params["conv1_w"].shape[2]          # out_channels
    Cr = params["se_w1"].shape[1]           # SE hidden width
    K = kernel_size

    CP = _round_up(max(Cin, C), LANE)       # lane-dense channel padding
    CRP = _round_up(Cr, LANE)
    halo = max(padding, K - 1 - padding, 1)
    OFF = _round_up(halo, 8)                # 8-aligned interior offset in the scratch

    # NCL -> NLC, channels zero-padded to CP lanes (one tiny copy of the raw input).
    x = jnp.transpose(x_ncl, (0, 2, 1)).astype(jnp.float32)
    x = jnp.pad(x, ((0, 0), (0, 0), (0, CP - Cin)))

    def prep_conv_w(w):                     # (K, cin, C) -> (K*CP, CP), zero-padded
        k_, cin_, cout_ = w.shape
        wp = jnp.zeros((k_, CP, CP), jnp.float32).at[:, :cin_, :cout_].set(w)
        return wp.reshape(k_ * CP, CP)

    def prep_vec(v, width):                 # (1, n) -> (1, width)
        return jnp.pad(v.astype(jnp.float32), ((0, 0), (0, width - v.shape[1])))

    def prep_mat(m, rows, cols):            # (a, b) -> (rows, cols)
        return jnp.zeros((rows, cols), jnp.float32).at[:m.shape[0], :m.shape[1]].set(m)

    args = [x]
    for i in (1, 2, 3):
        args += [prep_conv_w(params[f"conv{i}_w"]),
                 prep_vec(params[f"bn{i}_gamma"], CP),
                 prep_vec(params[f"bn{i}_beta"], CP)]
    args += [prep_mat(params["se_w1"], CP, CRP),
             prep_vec(params["se_b1"], CRP),
             prep_mat(params["se_w2"], CRP, CP),
             prep_vec(params["se_b2"], CP)]

    kernel = functools.partial(cnn_block_kernel, K=K, PAD=padding, OFF=OFF)

    # TODO(synk): for large B*L, add a grid over B*L tiles (two-pass global BN
    # reduction, "parallel" batch semantics for multi-TC chips); at these shapes the
    # whole fused block fits comfortably in VMEM as a single program.
    out_padded = pl.pallas_call(
        kernel,
        out_shape=jax.ShapeDtypeStruct((B, L, CP), jnp.float32),
        in_specs=[pl.BlockSpec(memory_space=pltpu.MemorySpace.VMEM)] * len(args),
        out_specs=pl.BlockSpec(memory_space=pltpu.MemorySpace.VMEM),
        scratch_shapes=[pltpu.VMEM((B, OFF + L + OFF, CP), jnp.float32)],
    )(*args)

    # Drop the padded channels, NLC -> NCL.
    return jnp.transpose(out_padded[:, :, :C], (0, 2, 1))


# ----------------------------------------------------------------------------
# Deterministic parameter initialization (shapes per CNNBlock.__init__).
# ----------------------------------------------------------------------------
def init_params(key, in_channels, out_channels, kernel_size, r):
    keys = jax.random.split(key, 16)
    p = {}
    cin = in_channels
    ki = 0
    for i in (1, 2, 3):
        # conv weight stored kernel-tap-major (K, Cin, Cout)
        p[f"conv{i}_w"] = (0.1 * jax.random.normal(
            keys[ki], (kernel_size, cin, out_channels))).astype(jnp.float32); ki += 1
        # Conv bias exists in the torch module but is mathematically cancelled by
        # train-mode BatchNorm (it shifts acc and its batch mean equally), so the
        # fused kernel does not consume it.
        p[f"conv{i}_b"] = (0.1 * jax.random.normal(
            keys[ki], (1, out_channels))).astype(jnp.float32); ki += 1
        p[f"bn{i}_gamma"] = (1.0 + 0.1 * jax.random.normal(
            keys[ki], (1, out_channels))).astype(jnp.float32); ki += 1
        p[f"bn{i}_beta"] = (0.1 * jax.random.normal(
            keys[ki], (1, out_channels))).astype(jnp.float32); ki += 1
        cin = out_channels
    cr = out_channels * r
    p["se_w1"] = (0.1 * jax.random.normal(keys[12], (out_channels, cr))).astype(jnp.float32)
    p["se_b1"] = (0.1 * jax.random.normal(keys[13], (1, cr))).astype(jnp.float32)
    p["se_w2"] = (0.1 * jax.random.normal(keys[14], (cr, out_channels))).astype(jnp.float32)
    p["se_b2"] = (0.1 * jax.random.normal(keys[15], (1, out_channels))).astype(jnp.float32)
    return p


if __name__ == "__main__":
    # CNNBlock(in_channels=4, out_channels=8, kernel_size=3, stride=1, padding=1, r=4)
    B, Cin, L = 2, 4, 16
    Cout, K, r = 8, 3, 4

    key = jax.random.PRNGKey(0)
    k_x, k_p = jax.random.split(key)
    x = jax.random.normal(k_x, (B, Cin, L), dtype=jnp.float32)  # NCL, like torch Conv1d
    params = init_params(k_p, Cin, Cout, K, r)

    out = cnn_block_forward(x, params, kernel_size=K, stride=1, padding=1)
    out = jax.block_until_ready(out)

    assert out.shape == (B, Cout, L), out.shape
    assert bool(jnp.all(jnp.isfinite(out)))
    assert bool(jnp.all(out >= 0.0))  # final ReLU
    print("KERNEL_OK")
</pallas_src>

<mosaic_0001>
module attributes {stable_mosaic.version = 11 : i64} {
  func.func @cnn_block_kernel(%arg0: memref<2x16x128xf32, #tpu.memory_space<vmem>>, %arg1: memref<384x128xf32, #tpu.memory_space<vmem>>, %arg2: memref<1x128xf32, #tpu.memory_space<vmem>>, %arg3: memref<1x128xf32, #tpu.memory_space<vmem>>, %arg4: memref<384x128xf32, #tpu.memory_space<vmem>>, %arg5: memref<1x128xf32, #tpu.memory_space<vmem>>, %arg6: memref<1x128xf32, #tpu.memory_space<vmem>>, %arg7: memref<384x128xf32, #tpu.memory_space<vmem>>, %arg8: memref<1x128xf32, #tpu.memory_space<vmem>>, %arg9: memref<1x128xf32, #tpu.memory_space<vmem>>, %arg10: memref<128x128xf32, #tpu.memory_space<vmem>>, %arg11: memref<1x128xf32, #tpu.memory_space<vmem>>, %arg12: memref<128x128xf32, #tpu.memory_space<vmem>>, %arg13: memref<1x128xf32, #tpu.memory_space<vmem>>, %arg14: memref<2x16x128xf32, #tpu.memory_space<vmem>>, %arg15: memref<2x32x128xf32, #tpu.memory_space<vmem>>) attributes {dimension_semantics = [], scalar_prefetch = 0 : i64, scratch_operands = 1 : i64, tpu.core_type = #tpu.core_type<tc>} {
    %cst = arith.constant 0.000000e+00 : f32
    %0 = vector.broadcast %cst : f32 to vector<2x32x128xf32>
    %c0 = arith.constant 0 : index
    %c0_0 = arith.constant 0 : index
    %c0_1 = arith.constant 0 : index
    %1 = vector.load %arg15[%c0, %c0_0, %c0_1] : memref<2x32x128xf32, #tpu.memory_space<vmem>>, vector<2x32x128xf32>
    tpu.vector_store %arg15[%c0, %c0_0, %c0_1], %0 {strides = array<i32>} : memref<2x32x128xf32, #tpu.memory_space<vmem>>, vector<2x32x128xf32>,
    %c0_2 = arith.constant 0 : index
    %c0_3 = arith.constant 0 : index
    %c0_4 = arith.constant 0 : index
    %2 = vector.load %arg0[%c0_2, %c0_3, %c0_4] : memref<2x16x128xf32, #tpu.memory_space<vmem>>, vector<2x16x128xf32>
    %c0_5 = arith.constant 0 : index
    %c8 = arith.constant 8 : index
    %c0_6 = arith.constant 0 : index
    %3 = vector.load %arg15[%c0_5, %c8, %c0_6] : memref<2x32x128xf32, #tpu.memory_space<vmem>>, vector<2x16x128xf32>
    tpu.vector_store %arg15[%c0_5, %c8, %c0_6], %2 {strides = array<i32>} : memref<2x32x128xf32, #tpu.memory_space<vmem>>, vector<2x16x128xf32>,
    %c0_7 = arith.constant 0 : index
    %c7 = arith.constant 7 : index
    %c0_8 = arith.constant 0 : index
    %4 = vector.load %arg15[%c0_7, %c7, %c0_8] : memref<2x32x128xf32, #tpu.memory_space<vmem>>, vector<2x16x128xf32>
    %c0_9 = arith.constant 0 : index
    %c8_10 = arith.constant 8 : index
    %c0_11 = arith.constant 0 : index
    %5 = vector.load %arg15[%c0_9, %c8_10, %c0_11] : memref<2x32x128xf32, #tpu.memory_space<vmem>>, vector<2x16x128xf32>
    %c0_12 = arith.constant 0 : index
    %c9 = arith.constant 9 : index
    %c0_13 = arith.constant 0 : index
    %6 = vector.load %arg15[%c0_12, %c9, %c0_13] : memref<2x32x128xf32, #tpu.memory_space<vmem>>, vector<2x16x128xf32>
    %7 = tpu.concatenate %4, %5, %6 in 2 : vector<2x16x128xf32>, vector<2x16x128xf32>, vector<2x16x128xf32> -> vector<2x16x384xf32>
    %8 = vector.shape_cast %7 : vector<2x16x384xf32> to vector<32x384xf32>
    %c0_14 = arith.constant 0 : index
    %c0_15 = arith.constant 0 : index
    %9 = vector.load %arg1[%c0_14, %c0_15] : memref<384x128xf32, #tpu.memory_space<vmem>>, vector<384x128xf32>
    %cst_16 = arith.constant dense<0.000000e+00> : vector<32x128xf32>
    %10 = tpu.matmul %8, %9, %cst_16 {dimension_numbers = #tpu.dot_dimension_numbers<[1], [0], [0], [1], [0, 0, 1, 1], [], []>} : vector<32x384xf32>, vector<384x128xf32>, vector<32x128xf32> -> vector<32x128xf32>
    %cst_17 = arith.constant dense<0.000000e+00> : vector<128xf32>
    %11 = vector.multi_reduction <add>, %10, %cst_17 [0] : vector<32x128xf32> to vector<128xf32>
    %12 = vector.shape_cast %11 : vector<128xf32> to vector<1x128xf32>
    %cst_18 = arith.constant 3.200000e+01 : f32
    %13 = vector.broadcast %cst_18 : f32 to vector<1x128xf32>
    %14 = arith.divf %12, %13 : vector<1x128xf32>
    %15 = vector.broadcast %14 : vector<1x128xf32> to vector<32x128xf32>
    %16 = arith.subf %10, %15 : vector<32x128xf32>
    %17 = arith.mulf %16, %16 : vector<32x128xf32>
    %cst_19 = arith.constant dense<0.000000e+00> : vector<128xf32>
    %18 = vector.multi_reduction <add>, %17, %cst_19 [0] : vector<32x128xf32> to vector<128xf32>
    %19 = vector.shape_cast %18 : vector<128xf32> to vector<1x128xf32>
    %cst_20 = arith.constant 3.200000e+01 : f32
    %20 = vector.broadcast %cst_20 : f32 to vector<1x128xf32>
    %21 = arith.divf %19, %20 : vector<1x128xf32>
    %c0_21 = arith.constant 0 : index
    %c0_22 = arith.constant 0 : index
    %22 = vector.load %arg2[%c0_21, %c0_22] : memref<1x128xf32, #tpu.memory_space<vmem>>, vector<1x128xf32>
    %cst_23 = arith.constant 9.99999974E-6 : f32
    %23 = vector.broadcast %cst_23 : f32 to vector<1x128xf32>
    %24 = arith.addf %21, %23 : vector<1x128xf32>
    %25 = math.rsqrt %24 : vector<1x128xf32>
    %26 = arith.mulf %22, %25 : vector<1x128xf32>
    %c0_24 = arith.constant 0 : index
    %c0_25 = arith.constant 0 : index
    %27 = vector.load %arg3[%c0_24, %c0_25] : memref<1x128xf32, #tpu.memory_space<vmem>>, vector<1x128xf32>
    %28 = arith.mulf %26, %14 : vector<1x128xf32>
    %29 = arith.subf %27, %28 : vector<1x128xf32>
    %30 = vector.broadcast %26 : vector<1x128xf32> to vector<32x128xf32>
    %31 = arith.mulf %30, %10 : vector<32x128xf32>
    %32 = vector.broadcast %29 : vector<1x128xf32> to vector<32x128xf32>
    %33 = arith.addf %31, %32 : vector<32x128xf32>
    %cst_26 = arith.constant 0.000000e+00 : f32
    %34 = vector.broadcast %cst_26 : f32 to vector<32x128xf32>
    %35 = arith.maximumf %33, %34 : vector<32x128xf32>
    %36 = vector.shape_cast %35 : vector<32x128xf32> to vector<2x16x128xf32>
    %c0_27 = arith.constant 0 : index
    %c8_28 = arith.constant 8 : index
    %c0_29 = arith.constant 0 : index
    %37 = vector.load %arg15[%c0_27, %c8_28, %c0_29] : memref<2x32x128xf32, #tpu.memory_space<vmem>>, vector<2x16x128xf32>
    tpu.vector_store %arg15[%c0_27, %c8_28, %c0_29], %36 {strides = array<i32>} : memref<2x32x128xf32, #tpu.memory_space<vmem>>, vector<2x16x128xf32>,
    %c0_30 = arith.constant 0 : index
    %c7_31 = arith.constant 7 : index
    %c0_32 = arith.constant 0 : index
    %38 = vector.load %arg15[%c0_30, %c7_31, %c0_32] : memref<2x32x128xf32, #tpu.memory_space<vmem>>, vector<2x16x128xf32>
    %c0_33 = arith.constant 0 : index
    %c8_34 = arith.constant 8 : index
    %c0_35 = arith.constant 0 : index
    %39 = vector.load %arg15[%c0_33, %c8_34, %c0_35] : memref<2x32x128xf32, #tpu.memory_space<vmem>>, vector<2x16x128xf32>
    %c0_36 = arith.constant 0 : index
    %c9_37 = arith.constant 9 : index
    %c0_38 = arith.constant 0 : index
    %40 = vector.load %arg15[%c0_36, %c9_37, %c0_38] : memref<2x32x128xf32, #tpu.memory_space<vmem>>, vector<2x16x128xf32>
    %41 = tpu.concatenate %38, %39, %40 in 2 : vector<2x16x128xf32>, vector<2x16x128xf32>, vector<2x16x128xf32> -> vector<2x16x384xf32>
    %42 = vector.shape_cast %41 : vector<2x16x384xf32> to vector<32x384xf32>
    %c0_39 = arith.constant 0 : index
    %c0_40 = arith.constant 0 : index
    %43 = vector.load %arg4[%c0_39, %c0_40] : memref<384x128xf32, #tpu.memory_space<vmem>>, vector<384x128xf32>
    %cst_41 = arith.constant dense<0.000000e+00> : vector<32x128xf32>
    %44 = tpu.matmul %42, %43, %cst_41 {dimension_numbers = #tpu.dot_dimension_numbers<[1], [0], [0], [1], [0, 0, 1, 1], [], []>} : vector<32x384xf32>, vector<384x128xf32>, vector<32x128xf32> -> vector<32x128xf32>
    %cst_42 = arith.constant dense<0.000000e+00> : vector<128xf32>
    %45 = vector.multi_reduction <add>, %44, %cst_42 [0] : vector<32x128xf32> to vector<128xf32>
    %46 = vector.shape_cast %45 : vector<128xf32> to vector<1x128xf32>
    %cst_43 = arith.constant 3.200000e+01 : f32
    %47 = vector.broadcast %cst_43 : f32 to vector<1x128xf32>
    %48 = arith.divf %46, %47 : vector<1x128xf32>
    %49 = vector.broadcast %48 : vector<1x128xf32> to vector<32x128xf32>
    %50 = arith.subf %44, %49 : vector<32x128xf32>
    %51 = arith.mulf %50, %50 : vector<32x128xf32>
    %cst_44 = arith.constant dense<0.000000e+00> : vector<128xf32>
    %52 = vector.multi_reduction <add>, %51, %cst_44 [0] : vector<32x128xf32> to vector<128xf32>
    %53 = vector.shape_cast %52 : vector<128xf32> to vector<1x128xf32>
    %cst_45 = arith.constant 3.200000e+01 : f32
    %54 = vector.broadcast %cst_45 : f32 to vector<1x128xf32>
    %55 = arith.divf %53, %54 : vector<1x128xf32>
    %c0_46 = arith.constant 0 : index
    %c0_47 = arith.constant 0 : index
    %56 = vector.load %arg5[%c0_46, %c0_47] : memref<1x128xf32, #tpu.memory_space<vmem>>, vector<1x128xf32>
    %cst_48 = arith.constant 9.99999974E-6 : f32
    %57 = vector.broadcast %cst_48 : f32 to vector<1x128xf32>
    %58 = arith.addf %55, %57 : vector<1x128xf32>
    %59 = math.rsqrt %58 : vector<1x128xf32>
    %60 = arith.mulf %56, %59 : vector<1x128xf32>
    %c0_49 = arith.constant 0 : index
    %c0_50 = arith.constant 0 : index
    %61 = vector.load %arg6[%c0_49, %c0_50] : memref<1x128xf32, #tpu.memory_space<vmem>>, vector<1x128xf32>
    %62 = arith.mulf %60, %48 : vector<1x128xf32>
    %63 = arith.subf %61, %62 : vector<1x128xf32>
    %64 = vector.broadcast %60 : vector<1x128xf32> to vector<32x128xf32>
    %65 = arith.mulf %64, %44 : vector<32x128xf32>
    %66 = vector.broadcast %63 : vector<1x128xf32> to vector<32x128xf32>
    %67 = arith.addf %65, %66 : vector<32x128xf32>
    %cst_51 = arith.constant 0.000000e+00 : f32
    %68 = vector.broadcast %cst_51 : f32 to vector<32x128xf32>
    %69 = arith.maximumf %67, %68 : vector<32x128xf32>
    %70 = vector.shape_cast %69 : vector<32x128xf32> to vector<2x16x128xf32>
    %c0_52 = arith.constant 0 : index
    %c8_53 = arith.constant 8 : index
    %c0_54 = arith.constant 0 : index
    %71 = vector.load %arg15[%c0_52, %c8_53, %c0_54] : memref<2x32x128xf32, #tpu.memory_space<vmem>>, vector<2x16x128xf32>
    tpu.vector_store %arg15[%c0_52, %c8_53, %c0_54], %70 {strides = array<i32>} : memref<2x32x128xf32, #tpu.memory_space<vmem>>, vector<2x16x128xf32>,
    %c0_55 = arith.constant 0 : index
    %c7_56 = arith.constant 7 : index
    %c0_57 = arith.constant 0 : index
    %72 = vector.load %arg15[%c0_55, %c7_56, %c0_57] : memref<2x32x128xf32, #tpu.memory_space<vmem>>, vector<2x16x128xf32>
    %c0_58 = arith.constant 0 : index
    %c8_59 = arith.constant 8 : index
    %c0_60 = arith.constant 0 : index
    %73 = vector.load %arg15[%c0_58, %c8_59, %c0_60] : memref<2x32x128xf32, #tpu.memory_space<vmem>>, vector<2x16x128xf32>
    %c0_61 = arith.constant 0 : index
    %c9_62 = arith.constant 9 : index
    %c0_63 = arith.constant 0 : index
    %74 = vector.load %arg15[%c0_61, %c9_62, %c0_63] : memref<2x32x128xf32, #tpu.memory_space<vmem>>, vector<2x16x128xf32>
    %75 = tpu.concatenate %72, %73, %74 in 2 : vector<2x16x128xf32>, vector<2x16x128xf32>, vector<2x16x128xf32> -> vector<2x16x384xf32>
    %76 = vector.shape_cast %75 : vector<2x16x384xf32> to vector<32x384xf32>
    %c0_64 = arith.constant 0 : index
    %c0_65 = arith.constant 0 : index
    %77 = vector.load %arg7[%c0_64, %c0_65] : memref<384x128xf32, #tpu.memory_space<vmem>>, vector<384x128xf32>
    %cst_66 = arith.constant dense<0.000000e+00> : vector<32x128xf32>
    %78 = tpu.matmul %76, %77, %cst_66 {dimension_numbers = #tpu.dot_dimension_numbers<[1], [0], [0], [1], [0, 0, 1, 1], [], []>} : vector<32x384xf32>, vector<384x128xf32>, vector<32x128xf32> -> vector<32x128xf32>
    %cst_67 = arith.constant dense<0.000000e+00> : vector<128xf32>
    %79 = vector.multi_reduction <add>, %78, %cst_67 [0] : vector<32x128xf32> to vector<128xf32>
    %80 = vector.shape_cast %79 : vector<128xf32> to vector<1x128xf32>
    %cst_68 = arith.constant 3.200000e+01 : f32
    %81 = vector.broadcast %cst_68 : f32 to vector<1x128xf32>
    %82 = arith.divf %80, %81 : vector<1x128xf32>
    %83 = vector.broadcast %82 : vector<1x128xf32> to vector<32x128xf32>
    %84 = arith.subf %78, %83 : vector<32x128xf32>
    %85 = arith.mulf %84, %84 : vector<32x128xf32>
    %cst_69 = arith.constant dense<0.000000e+00> : vector<128xf32>
    %86 = vector.multi_reduction <add>, %85, %cst_69 [0] : vector<32x128xf32> to vector<128xf32>
    %87 = vector.shape_cast %86 : vector<128xf32> to vector<1x128xf32>
    %cst_70 = arith.constant 3.200000e+01 : f32
    %88 = vector.broadcast %cst_70 : f32 to vector<1x128xf32>
    %89 = arith.divf %87, %88 : vector<1x128xf32>
    %c0_71 = arith.constant 0 : index
    %c0_72 = arith.constant 0 : index
    %90 = vector.load %arg8[%c0_71, %c0_72] : memref<1x128xf32, #tpu.memory_space<vmem>>, vector<1x128xf32>
    %cst_73 = arith.constant 9.99999974E-6 : f32
    %91 = vector.broadcast %cst_73 : f32 to vector<1x128xf32>
    %92 = arith.addf %89, %91 : vector<1x128xf32>
    %93 = math.rsqrt %92 : vector<1x128xf32>
    %94 = arith.mulf %90, %93 : vector<1x128xf32>
    %c0_74 = arith.constant 0 : index
    %c0_75 = arith.constant 0 : index
    %95 = vector.load %arg9[%c0_74, %c0_75] : memref<1x128xf32, #tpu.memory_space<vmem>>, vector<1x128xf32>
    %96 = arith.mulf %94, %82 : vector<1x128xf32>
    %97 = arith.subf %95, %96 : vector<1x128xf32>
    %98 = vector.broadcast %94 : vector<1x128xf32> to vector<32x128xf32>
    %99 = arith.mulf %98, %78 : vector<32x128xf32>
    %100 = vector.broadcast %97 : vector<1x128xf32> to vector<32x128xf32>
    %101 = arith.addf %99, %100 : vector<32x128xf32>
    %cst_76 = arith.constant 0.000000e+00 : f32
    %102 = vector.broadcast %cst_76 : f32 to vector<32x128xf32>
    %103 = arith.maximumf %101, %102 : vector<32x128xf32>
    %104 = vector.shape_cast %103 : vector<32x128xf32> to vector<2x16x128xf32>
    %cst_77 = arith.constant dense<0.000000e+00> : vector<2x128xf32>
    %105 = vector.multi_reduction <add>, %104, %cst_77 [1] : vector<2x16x128xf32> to vector<2x128xf32>
    %cst_78 = arith.constant 1.600000e+01 : f32
    %106 = vector.broadcast %cst_78 : f32 to vector<2x128xf32>
    %107 = arith.divf %105, %106 : vector<2x128xf32>
    %c0_79 = arith.constant 0 : index
    %c0_80 = arith.constant 0 : index
    %108 = vector.load %arg10[%c0_79, %c0_80] : memref<128x128xf32, #tpu.memory_space<vmem>>, vector<128x128xf32>
    %cst_81 = arith.constant dense<0.000000e+00> : vector<2x128xf32>
    %109 = tpu.matmul %107, %108, %cst_81 {dimension_numbers = #tpu.dot_dimension_numbers<[1], [0], [0], [1], [0, 0, 1, 1], [], []>} : vector<2x128xf32>, vector<128x128xf32>, vector<2x128xf32> -> vector<2x128xf32>
    %c0_82 = arith.constant 0 : index
    %c0_83 = arith.constant 0 : index
    %110 = vector.load %arg11[%c0_82, %c0_83] : memref<1x128xf32, #tpu.memory_space<vmem>>, vector<1x128xf32>
    %111 = vector.broadcast %110 : vector<1x128xf32> to vector<2x128xf32>
    %112 = arith.addf %109, %111 : vector<2x128xf32>
    %cst_84 = arith.constant 0.000000e+00 : f32
    %113 = vector.broadcast %cst_84 : f32 to vector<2x128xf32>
    %114 = arith.maximumf %112, %113 : vector<2x128xf32>
    %c0_85 = arith.constant 0 : index
    %c0_86 = arith.constant 0 : index
    %115 = vector.load %arg12[%c0_85, %c0_86] : memref<128x128xf32, #tpu.memory_space<vmem>>, vector<128x128xf32>
    %cst_87 = arith.constant dense<0.000000e+00> : vector<2x128xf32>
    %116 = tpu.matmul %114, %115, %cst_87 {dimension_numbers = #tpu.dot_dimension_numbers<[1], [0], [0], [1], [0, 0, 1, 1], [], []>} : vector<2x128xf32>, vector<128x128xf32>, vector<2x128xf32> -> vector<2x128xf32>
    %c0_88 = arith.constant 0 : index
    %c0_89 = arith.constant 0 : index
    %117 = vector.load %arg13[%c0_88, %c0_89] : memref<1x128xf32, #tpu.memory_space<vmem>>, vector<1x128xf32>
    %118 = vector.broadcast %117 : vector<1x128xf32> to vector<2x128xf32>
    %119 = arith.addf %116, %118 : vector<2x128xf32>
    %120 = arith.negf %119 : vector<2x128xf32>
    %121 = math.exp %120 : vector<2x128xf32>
    %cst_90 = arith.constant 1.000000e+00 : f32
    %122 = vector.broadcast %cst_90 : f32 to vector<2x128xf32>
    %123 = arith.addf %122, %121 : vector<2x128xf32>
    %124 = arith.divf %122, %123 : vector<2x128xf32>
    %125 = vector.shape_cast %124 : vector<2x128xf32> to vector<2x1x128xf32>
    %126 = vector.broadcast %125 : vector<2x1x128xf32> to vector<2x16x128xf32>
    %127 = arith.mulf %104, %126 : vector<2x16x128xf32>
    %cst_91 = arith.constant 0.000000e+00 : f32
    %128 = vector.broadcast %cst_91 : f32 to vector<2x16x128xf32>
    %129 = arith.maximumf %127, %128 : vector<2x16x128xf32>
    %c0_92 = arith.constant 0 : index
    %c0_93 = arith.constant 0 : index
    %c0_94 = arith.constant 0 : index
    %130 = vector.load %arg14[%c0_92, %c0_93, %c0_94] : memref<2x16x128xf32, #tpu.memory_space<vmem>>, vector<2x16x128xf32>
    tpu.vector_store %arg14[%c0_92, %c0_93, %c0_94], %129 {strides = array<i32>} : memref<2x16x128xf32, #tpu.memory_space<vmem>>, vector<2x16x128xf32>,
    return
  }
}

</mosaic_0001>

<bundles_post_ra>
// kernel: cnn_block_forward.1
= control target key start
LH: loop header
LB: loop body
LE: loop exit
PB: predicated region body
PF: predicated region fallthrough
CT: control target
= control target key end

     0   :  { %v891_v3 = vmov 0.0   ;;  %vm750_vm11 = vcmask 1041409   ;;  %s1698_s1 = inlined_call_operand.vmem [shape: f32[384,128], index: 1, kind: input, shape index: {}]   ;;  %s1699_s0 = inlined_call_operand.vmem [shape: f32[2,16,128], index: 0, kind: input, shape index: {}]   ;;  %s1700_s4 = inlined_call_operand.vmem [shape: f32[384,128], index: 4, kind: input, shape index: {}]   ;;  %s1701_s2 = inlined_call_operand.vmem [shape: f32[1,128], index: 2, kind: input, shape index: {}]   ;;  %s1702_s3 = inlined_call_operand.vmem [shape: f32[1,128], index: 3, kind: input, shape index: {}]   ;;  %s1703_s7 = inlined_call_operand.vmem [shape: f32[384,128], index: 7, kind: input, shape index: {}]   ;;  %s1704_s5 = inlined_call_operand.vmem [shape: f32[1,128], index: 5, kind: input, shape index: {}]   ;;  %s1705_s6 = inlined_call_operand.vmem [shape: f32[1,128], index: 6, kind: input, shape index: {}]   ;;  %s1706_s11 = inlined_call_operand.vmem [shape: f32[1,128], index: 11, kind: input, shape index: {}]   ;;  %s1707_s10 = inlined_call_operand.vmem [shape: f32[128,128], index: 10, kind: input, shape index: {}]   ;;  %s1708_s8 = inlined_call_operand.vmem [shape: f32[1,128], index: 8, kind: input, shape index: {}]   ;;  %s1709_s12 = inlined_call_operand.vmem [shape: f32[128,128], index: 12, kind: input, shape index: {}]   ;;  %s1710_s9 = inlined_call_operand.vmem [shape: f32[1,128], index: 9, kind: input, shape index: {}]   ;;  %s1711_s13 = inlined_call_operand.vmem [shape: f32[1,128], index: 13, kind: input, shape index: {}]   ;;  %s1712_s14 = inlined_call_operand.vmem [shape: f32[2,16,128], index: 14, kind: output, shape index: {}]  }
   0x1   :  { %v122_v0 = vld [vmem:[%s1698_s1 + $0x178] sm:$0xff]  ;;  %v121_v1 = vld [vmem:[%s1698_s1 + $0x170] sm:$0xff]  ;;  %47 = vst [vmem:[#allocation2] sm:$0xff] %v891_v3  ;;  %v120_v6 = vld [vmem:[%s1698_s1 + $0x168] sm:$0xff] }
   0x2   :  { %v90_v2 = vld [vmem:[%s1698_s1 + $0x78] sm:$0xff]  ;;  %181 = vmatpush.msra.mxu2 %v122_v0  ;;  %v89_v5 = vld [vmem:[%s1698_s1 + $0x70] sm:$0xff]  ;;  %50 = vst [vmem:[#allocation2 + $0x18] sm:$0xff] %v891_v3  ;;  %v88_v8 = vld [vmem:[%s1698_s1 + $0x68] sm:$0xff] }
   0x3   :  { %123 = vmatpush.msra.mxu0 %v90_v2  ;;  %v106_v4 = vld [vmem:[%s1698_s1 + $0xf8] sm:$0xff]  ;;  %v105_v7 = vld [vmem:[%s1698_s1 + $0xf0] sm:$0xff]  ;;  %51 = vst [vmem:[#allocation2 + $0x20] sm:$0xff] %v891_v3  ;;  %v104_v9 = vld [vmem:[%s1698_s1 + $0xe8] sm:$0xff] }
   0x4   :  { %152 = vmatpush.msra.mxu1 %v106_v4  ;;  %182 = vmatpush.msra.mxu2 %v121_v1  ;;  %54 = vst [vmem:[#allocation2 + $0x38] sm:$0xff] %v891_v3  ;;  %v119_v10 = vld [vmem:[%s1698_s1 + $0x160] sm:$0xff]  ;;  %v118_v13 = vld [vmem:[%s1698_s1 + $0x158] sm:$0xff]  ;;  %v117_v16 = vld [vmem:[%s1698_s1 + $0x150] sm:$0xff] }
   0x5   :  { %124 = vmatpush.msra.mxu0 %v89_v5  ;;  %v87_v11 = vld [vmem:[%s1698_s1 + $0x60] sm:$0xff]  ;;  %v86_v14 = vld [vmem:[%s1698_s1 + $0x58] sm:$0xff]  ;;  %v85_v17 = vld [vmem:[%s1698_s1 + $0x50] sm:$0xff]  ;;  %v892_v5 = vmov 32.0  }
   0x6   :  { %153 = vmatpush.msra.mxu1 %v105_v7  ;;  %183 = vmatpush.msra.mxu2 %v120_v6  ;;  %v103_v12 = vld [vmem:[%s1698_s1 + $0xe0] sm:$0xff]  ;;  %v102_v15 = vld [vmem:[%s1698_s1 + $0xd8] sm:$0xff]  ;;  %v101_v18 = vld [vmem:[%s1698_s1 + $0xd0] sm:$0xff]  ;;  %877 = vrcp.f32 %v892_v5 }
   0x7   :  { %125 = vmatpush.msra.mxu0 %v88_v8  ;;  %v116_v19 = vld [vmem:[%s1698_s1 + $0x148] sm:$0xff]  ;;  %v115_v22 = vld [vmem:[%s1698_s1 + $0x140] sm:$0xff]  ;;  %v114_v25 = vld [vmem:[%s1698_s1 + $0x138] sm:$0xff] }
   0x8   :  { %154 = vmatpush.msra.mxu1 %v104_v9  ;;  %184 = vmatpush.msra.mxu2 %v119_v10  ;;  %v84_v20 = vld [vmem:[%s1698_s1 + $0x48] sm:$0xff]  ;;  %v83_v23 = vld [vmem:[%s1698_s1 + $0x40] sm:$0xff]  ;;  %v82_v26 = vld [vmem:[%s1698_s1 + $0x38] sm:$0xff] }
   0x9   :  { %126 = vmatpush.msra.mxu0 %v87_v11  ;;  %v100_v21 = vld [vmem:[%s1698_s1 + $0xc8] sm:$0xff]  ;;  %v99_v24 = vld [vmem:[%s1698_s1 + $0xc0] sm:$0xff]  ;;  %v98_v28 = vld [vmem:[%s1698_s1 + $0xb8] sm:$0xff] }
   0xa   :  { %155 = vmatpush.msra.mxu1 %v103_v12  ;;  %185 = vmatpush.msra.mxu2 %v118_v13  ;;  %v55_v27 = vld [vmem:[%s1699_s0] sm:$0xff]  ;;  %v56_v29 = vld [vmem:[%s1699_s0 + $0x8] sm:$0xff]  ;;  %v113_v30 = vld [vmem:[%s1698_s1 + $0x130] sm:$0xff] }
   0xb   :  { %127 = vmatpush.msra.mxu0 %v86_v14  ;;  %59 = vst [vmem:[#allocation2 + $0x8] sm:$0xff] %v55_v27  ;;  %v81_v31 = vld [vmem:[%s1698_s1 + $0x30] sm:$0xff]  ;;  %v58_v34 = vld [vmem:[%s1699_s0 + $0x18] sm:$0xff]  ;;  %v112_v35 = vld [vmem:[%s1698_s1 + $0x128] sm:$0xff] }
   0xc   :  { %156 = vmatpush.msra.mxu1 %v102_v15  ;;  %186 = vmatpush.msra.mxu2 %v117_v16  ;;  %60 = vst [vmem:[#allocation2 + $0x10] sm:$0xff] %v56_v29  ;;  %v57_v32 = vld [vmem:[%s1699_s0 + $0x10] sm:$0xff]  ;;  %v80_v36 = vld [vmem:[%s1698_s1 + $0x28] sm:$0xff]  ;;  %v111_v38 = vld [vmem:[%s1698_s1 + $0x120] sm:$0xff]  ;;  %v878_v10 = vpop.eup %877 }
   0xd   :  { %128 = vmatpush.msra.mxu0 %v85_v17  ;;  %v97_v33 = vld [vmem:[%s1698_s1 + $0xb0] sm:$0xff]  ;;  %61 = vst [vmem:[#allocation2 + $0x28] sm:$0xff] %v57_v32  ;;  %v96_v37 = vld [vmem:[%s1698_s1 + $0xa8] sm:$0xff]  ;;  %v79_v39 = vld [vmem:[%s1698_s1 + $0x20] sm:$0xff]  ;;  %v220_v17 = vmul.f32 32.0, %v878_v10  ;;  %vm224_vm0 = vweird.f32 %v878_v10 }
   0xe   :  { %157 = vmatpush.msra.mxu1 %v101_v18  ;;  %187 = vmatpush.msra.mxu2 %v116_v19  ;;  %62 = vst [vmem:[#allocation2 + $0x30] sm:$0xff] %v58_v34  ;;  %v95_v40 = vld [vmem:[%s1698_s1 + $0xa0] sm:$0xff]  ;;  %v110_v41 = vld [vmem:[%s1698_s1 + $0x118] sm:$0xff]  ;;  %v109_v44 = vld [vmem:[%s1698_s1 + $0x110] sm:$0xff] }
   0xf   :  { %129 = vmatpush.msra.mxu0 %v84_v20  ;;  %v78_v42 = vld [vmem:[%s1698_s1 + $0x18] sm:$0xff]  ;;  %v77_v45 = vld [vmem:[%s1698_s1 + $0x10] sm:$0xff]  ;;  %v108_v47 = vld [vmem:[%s1698_s1 + $0x108] sm:$0xff] }
  0x10   :  { %158 = vmatpush.msra.mxu1 %v100_v21  ;;  %188 = vmatpush.msra.mxu2 %v115_v22  ;;  %v94_v43 = vld [vmem:[%s1698_s1 + $0x98] sm:$0xff]  ;;  %v93_v46 = vld [vmem:[%s1698_s1 + $0x90] sm:$0xff]  ;;  %v76_v48 = vld [vmem:[%s1698_s1 + $0x8] sm:$0xff]  ;;  %v221_v22 = vsub.f32 1.0, %v220_v17 }
  0x11   :  { %130 = vmatpush.msra.mxu0 %v83_v23  ;;  %v92_v49 = vld [vmem:[%s1698_s1 + $0x88] sm:$0xff]  ;;  %v107_v50 = vld [vmem:[%s1698_s1 + $0x100] sm:$0xff]  ;;  %v302_v17 = vld [vmem:[%s1700_s4 + $0x38] sm:$0xff] }
  0x12   :  { %159 = vmatpush.msra.mxu1 %v99_v24  ;;  %189 = vmatpush.msra.mxu2 %v114_v25  ;;  %v75_v51 = vld [vmem:[%s1698_s1] sm:$0xff]  ;;  %v222_v25 = vmul.f32 %v878_v10, %v221_v22  ;;  %v301_v22 = vld [vmem:[%s1700_s4 + $0x30] sm:$0xff] }
  0x13   :  { %131 = vmatpush.msra.mxu0 %v82_v26  ;;  %v71_v52 = vld [vmem:[#allocation2 + $0x9] sm:$0xff]  ;;  %v91_v53 = vld [vmem:[%s1698_s1 + $0x80] sm:$0xff]  ;;  %v72_v55 = vld [vmem:[#allocation2 + $0x11] sm:$0xff] }
  0x14   :  { %160 = vmatpush.msra.mxu1 %v98_v28  ;;  %190 = vmatpush.msra.mxu2 %v113_v30  ;;  %v63_v54 = vld [vmem:[#allocation2 + $0x7] sm:$0xff]  ;;  %v64_v56 = vld [vmem:[#allocation2 + $0xf] sm:$0xff]  ;;  %v223_v28 = vadd.f32 %v878_v10, %v222_v25 }
  0x15   :  { %132 = vmatpush.msra.mxu0 %v81_v31  ;;  %v73_v57 = vld [vmem:[#allocation2 + $0x29] sm:$0xff]  ;;  %v74_v59 = vld [vmem:[#allocation2 + $0x31] sm:$0xff] }
  0x16   :  { %161 = vmatpush.msra.mxu1 %v97_v33  ;;  %191 = vmatpush.msra.mxu2 %v112_v35  ;;  %v65_v58 = vld [vmem:[#allocation2 + $0x27] sm:$0xff]  ;;  %v66_v60 = vld [vmem:[#allocation2 + $0x2f] sm:$0xff]  ;;  %v1137_v31 = vsel %vm224_vm0, %v878_v10, %v223_v28 }
  0x17   :  { %133 = vmatpush.msra.mxu0 %v80_v36  ;;  %v324_v36 = vld [vmem:[%s1700_s4 + $0xe8] sm:$0xff]  ;;  %v303_v10 = vld [vmem:[%s1700_s4 + $0x40] sm:$0xff] }
  0x18   :  { %162 = vmatpush.msra.mxu1 %v96_v37  ;;  %192 = vmatpush.msra.mxu2 %v111_v38  ;;  %v312_v28 = vld [vmem:[%s1700_s4 + $0x88] sm:$0xff] }
  0x19   :  { %134 = vmatpush.msra.mxu0 %v79_v39 }
  0x1a   :  { %163 = vmatpush.msra.mxu1 %v95_v40  ;;  %193 = vmatpush.msra.mxu2 %v110_v41  ;;  %v323_v40 = vld [vmem:[%s1700_s4 + $0xe0] sm:$0xff] }
  0x1b   :  { %135 = vmatpush.msra.mxu0 %v78_v42 }
  0x1c   :  { %164 = vmatpush.msra.mxu1 %v94_v43  ;;  %194 = vmatpush.msra.mxu2 %v109_v44  ;;  %v310_v44 = vld [vmem:[%s1700_s4 + $0x78] sm:$0xff] }
  0x1d   :  { %136 = vmatpush.msra.mxu0 %v77_v45  ;;  %v342_v45 = vld [vmem:[%s1700_s4 + $0x178] sm:$0xff]  ;;  %343 = vmatpush.msra.mxu3 %v310_v44 }
  0x1e   :  { %165 = vmatpush.msra.mxu1 %v93_v46  ;;  %195 = vmatpush.msra.mxu2 %v108_v47  ;;  %v322_v46 = vld [vmem:[%s1700_s4 + $0xd8] sm:$0xff] }
  0x1f   :  { %137 = vmatpush.msra.mxu0 %v76_v48 }
  0x20   :  { %166 = vmatpush.msra.mxu1 %v92_v49  ;;  %196 = vmatpush.msra.mxu2 %v107_v50  ;;  %v309_v49 = vld [vmem:[%s1700_s4 + $0x70] sm:$0xff] }
  0x21   :  { %138 = vmatpush.msra.mxu0 %v75_v51  ;;  %197 = vmatmul.f32.vlgmr.msra.gmra.mxu2 %v71_v52  ;;  %v341_v50 = vld [vmem:[%s1700_s4 + $0x170] sm:$0xff] }
  0x22   :  { %167 = vmatpush.msra.mxu1 %v91_v53  ;;  %139 = vmatmul.f32.vlgmr.msra.gmra.mxu0 %v63_v54  ;;  %v321_v51 = vld [vmem:[%s1700_s4 + $0xd0] sm:$0xff]  ;;  %v308_v54 = vld [vmem:[%s1700_s4 + $0x68] sm:$0xff] }
  0x23   :  { %168 = vmatmul.f32.vlgmr.msra.gmra.mxu1 %v55_v27  ;;  %344 = vmatpush.msra.mxu3 %v309_v49 }
  0x24   :  { %401 = vmatpush.msrb.mxu1 %v342_v45 }
  0x25   :  { %345 = vmatpush.msra.mxu3 %v308_v54 }
  0x26   :  { %402 = vmatpush.msrb.mxu1 %v341_v50 }
  0x29   :  { %200 = vmatmul.f32.gmra.mxu2 %v72_v55  ;;  %v340_v55 = vld [vmem:[%s1700_s4 + $0x168] sm:$0xff] }
  0x2a   :  { %142 = vmatmul.f32.gmra.mxu0 %v64_v56  ;;  %v320_v56 = vld [vmem:[%s1700_s4 + $0xc8] sm:$0xff]  ;;  %403 = vmatpush.msrb.mxu1 %v340_v55 }
  0x2b   :  { %171 = vmatmul.f32.gmra.mxu1 %v56_v29 }
  0x31   :  { %203 = vmatmul.f32.gmra.mxu2 %v73_v57 }
  0x32   :  { %145 = vmatmul.f32.gmra.mxu0 %v65_v58  ;;  %v307_v58 = vld [vmem:[%s1700_s4 + $0x60] sm:$0xff] }
  0x33   :  { %174 = vmatmul.f32.gmra.mxu1 %v57_v32  ;;  %v326_v32 = vld [vmem:[%s1700_s4 + $0xf8] sm:$0xff]  ;;  %346 = vmatpush.msra.mxu3 %v307_v58 }
  0x34   :  { %372 = vmatpush.msrb.mxu0 %v326_v32  ;;  %v331_v32 = vld [vmem:[%s1700_s4 + $0x120] sm:$0xff] }
  0x39   :  { %206 = vmatmul.f32.gmra.mxu2 %v74_v59  ;;  %v339_v59 = vld [vmem:[%s1700_s4 + $0x160] sm:$0xff] }
  0x3a   :  { %148 = vmatmul.f32.gmra.mxu0 %v66_v60  ;;  %v319_v60 = vld [vmem:[%s1700_s4 + $0xc0] sm:$0xff]  ;;  %404 = vmatpush.msrb.mxu1 %v339_v59 }
  0x3b   :  { %177 = vmatmul.f32.gmra.mxu1 %v58_v34  ;;  %v325_v34 = vld [vmem:[%s1700_s4 + $0xf0] sm:$0xff] }
  0x3c   :  { %373 = vmatpush.msrb.mxu0 %v325_v34  ;;  %v298_v34 = vld [vmem:[%s1700_s4 + $0x18] sm:$0xff] }
  0x3e   :  { %374 = vmatpush.msrb.mxu0 %v324_v36  ;;  %v330_v36 = vld [vmem:[%s1700_s4 + $0x118] sm:$0xff] }
  0x40   :  { %375 = vmatpush.msrb.mxu0 %v323_v40  ;;  %v328_v40 = vld [vmem:[%s1700_s4 + $0x108] sm:$0xff] }
  0x42   :  { %376 = vmatpush.msrb.mxu0 %v322_v46 }
  0x44   :  { %377 = vmatpush.msrb.mxu0 %v321_v51 }
  0x46   :  { %378 = vmatpush.msrb.mxu0 %v320_v56 }
  0x48   :  { %379 = vmatpush.msrb.mxu0 %v319_v60 }
  0x9f   :  { %v140_v61 = vpop.f32.mrf.mxu0 }
  0xa0   :  { %v169_v62 = vpop.f32.mrf.mxu1 }
  0xa1   :  { %v170_v8 = vadd.f32 %v169_v62, %v140_v61  ;;  %v306_v62 = vld [vmem:[%s1700_s4 + $0x58] sm:$0xff] }
  0xa2   :  { %347 = vmatpush.msra.mxu3 %v306_v62 }
  0xa4   :  { %v198_v63 = vpop.f32.mrf.mxu2 }
  0xa5   :  { %v1127_v14 = vadd.f32 %v198_v63, %v170_v8  ;;  %v338_v63 = vld [vmem:[%s1700_s4 + $0x158] sm:$0xff]  ;;  %v316_v8 = vld [vmem:[%s1700_s4 + $0xa8] sm:$0xff] }
  0xa6   :  { %405 = vmatpush.msrb.mxu1 %v338_v63 }
  0xa7   :  { %v143_v0 = vpop.f32.mrf.mxu0 }
  0xa8   :  { %v172_v1 = vpop.f32.mrf.mxu1 }
  0xa9   :  { %v173_v6 = vadd.f32 %v172_v1, %v143_v0  ;;  %v318_v0 = vld [vmem:[%s1700_s4 + $0xb8] sm:$0xff] }
  0xaa   :  { %380 = vmatpush.msrb.mxu0 %v318_v0 }
  0xac   :  { %v201_v2 = vpop.f32.mrf.mxu2 }
  0xad   :  { %v1125_v11 = vadd.f32 %v201_v2, %v173_v6  ;;  %v305_v2 = vld [vmem:[%s1700_s4 + $0x50] sm:$0xff]  ;;  %v304_v6 = vld [vmem:[%s1700_s4 + $0x48] sm:$0xff] }
  0xae   :  { %348 = vmatpush.msra.mxu3 %v305_v2 }
  0xaf   :  { %v146_v3 = vpop.f32.mrf.mxu0  ;;  %v210_v18 = vadd.f32 %v1125_v11, %v1127_v14 }
  0xb0   :  { %v175_v4 = vpop.f32.mrf.mxu1  ;;  %349 = vmatpush.msra.mxu3 %v304_v6 }
  0xb1   :  { %v176_v9 = vadd.f32 %v175_v4, %v146_v3  ;;  %v337_v3 = vld [vmem:[%s1700_s4 + $0x150] sm:$0xff] }
  0xb2   :  { %v317_v4 = vld [vmem:[%s1700_s4 + $0xb0] sm:$0xff]  ;;  %406 = vmatpush.msrb.mxu1 %v337_v3  ;;  %350 = vmatpush.msra.mxu3 %v303_v10 }
  0xb3   :  { %381 = vmatpush.msrb.mxu0 %v317_v4 }
  0xb4   :  { %v204_v7 = vpop.f32.mrf.mxu2  ;;  %351 = vmatpush.msra.mxu3 %v302_v17 }
  0xb5   :  { %v1129_v15 = vadd.f32 %v204_v7, %v176_v9  ;;  %v336_v7 = vld [vmem:[%s1700_s4 + $0x148] sm:$0xff]  ;;  %382 = vmatpush.msrb.mxu0 %v316_v8 }
  0xb6   :  { %407 = vmatpush.msrb.mxu1 %v336_v7  ;;  %352 = vmatpush.msra.mxu3 %v301_v22 }
  0xb7   :  { %v149_v12 = vpop.f32.mrf.mxu0  ;;  %v211_v20 = vadd.f32 %v210_v18, %v1129_v15  ;;  %v334_v18 = vld [vmem:[%s1700_s4 + $0x138] sm:$0xff] }
  0xb8   :  { %v178_v13 = vpop.f32.mrf.mxu1 }
  0xb9   :  { %v179_v16 = vadd.f32 %v178_v13, %v149_v12  ;;  %v335_v12 = vld [vmem:[%s1700_s4 + $0x140] sm:$0xff] }
  0xba   :  { %v315_v13 = vld [vmem:[%s1700_s4 + $0xa0] sm:$0xff]  ;;  %408 = vmatpush.msrb.mxu1 %v335_v12 }
  0xbb   :  { %383 = vmatpush.msrb.mxu0 %v315_v13 }
  0xbc   :  { %v207_v19 = vpop.f32.mrf.mxu2  ;;  %409 = vmatpush.msrb.mxu1 %v334_v18 }
  0xbd   :  { %v1134_v21 = vadd.f32 %v207_v19, %v179_v16  ;;  %v314_v19 = vld [vmem:[%s1700_s4 + $0x98] sm:$0xff] }
  0xbe   :  { %384 = vmatpush.msrb.mxu0 %v314_v19 }
  0xbf   :  { %v212_v23 = vadd.f32 %v211_v20, %v1134_v21 }
  0xc1   :  { %v213_v24 = vrot.slane %v212_v23, 4 }
  0xc3   :  { %v214_v26 = vadd.f32 %v213_v24, %v212_v23  ;;  %v333_v23 = vld [vmem:[%s1700_s4 + $0x130] sm:$0xff] }
  0xc4   :  { %v313_v24 = vld [vmem:[%s1700_s4 + $0x90] sm:$0xff]  ;;  %410 = vmatpush.msrb.mxu1 %v333_v23 }
  0xc5   :  { %v215_v27 = vrot.slane %v214_v26, 2  ;;  %385 = vmatpush.msrb.mxu0 %v313_v24 }
  0xc7   :  { %v216_v29 = vadd.f32 %v215_v27, %v214_v26  ;;  %v300_v26 = vld [vmem:[%s1700_s4 + $0x28] sm:$0xff]  ;;  %386 = vmatpush.msrb.mxu0 %v312_v28 }
  0xc8   :  { %v332_v27 = vld [vmem:[%s1700_s4 + $0x128] sm:$0xff]  ;;  %353 = vmatpush.msra.mxu3 %v300_v26 }
  0xc9   :  { %v217_v30 = vrot.slane %v216_v29, 1  ;;  %411 = vmatpush.msrb.mxu1 %v332_v27 }
  0xcb   :  { %v218_v33 = vadd.f32 %v217_v30, %v216_v29  ;;  %v299_v30 = vld [vmem:[%s1700_s4 + $0x20] sm:$0xff]  ;;  %412 = vmatpush.msrb.mxu1 %v331_v32 }
  0xcc   :  { %354 = vmatpush.msra.mxu3 %v299_v30 }
  0xcd   :  { %v1146_v35 = vmul.f32 %v1137_v31, %v218_v33  ;;  %v311_v33 = vld [vmem:[%s1700_s4 + $0x80] sm:$0xff]  ;;  %413 = vmatpush.msrb.mxu1 %v330_v36 }
  0xce   :  { %387 = vmatpush.msrb.mxu0 %v311_v33  ;;  %355 = vmatpush.msra.mxu3 %v298_v34 }
  0xcf   :  { %v227_v37 = vsub.f32 %v1127_v14, %v1146_v35  ;;  %v228_v38 = vsub.f32 %v1125_v11, %v1146_v35  ;;  %v229_v39 = vsub.f32 %v1129_v15, %v1146_v35  ;;  %v230_v41 = vsub.f32 %v1134_v21, %v1146_v35 }
  0xd1   :  { %v231_v42 = vmul.f32 %v227_v37, %v227_v37  ;;  %v232_v43 = vmul.f32 %v228_v38, %v228_v38  ;;  %v233_v47 = vmul.f32 %v229_v39, %v229_v39  ;;  %v234_v52 = vmul.f32 %v230_v41, %v230_v41  ;;  %v297_v37 = vld [vmem:[%s1700_s4 + $0x10] sm:$0xff]  ;;  %v296_v39 = vld [vmem:[%s1700_s4 + $0x8] sm:$0xff]  ;;  %v295_v41 = vld [vmem:[%s1700_s4] sm:$0xff] }
  0xd2   :  { %v329_v38 = vld [vmem:[%s1700_s4 + $0x110] sm:$0xff]  ;;  %356 = vmatpush.msra.mxu3 %v297_v37 }
  0xd3   :  { %v235_v48 = vadd.f32 %v232_v43, %v231_v42  ;;  %414 = vmatpush.msrb.mxu1 %v329_v38  ;;  %v327_v42 = vld [vmem:[%s1700_s4 + $0x100] sm:$0xff] }
  0xd4   :  { %357 = vmatpush.msra.mxu3 %v296_v39 }
  0xd5   :  { %v236_v53 = vadd.f32 %v235_v48, %v233_v47  ;;  %415 = vmatpush.msrb.mxu1 %v328_v40  ;;  %v245_v48 = vld [vmem:[%s1701_s2] sm:$0x1] }
  0xd6   :  { %358 = vmatpush.msra.mxu3 %v295_v41 }
  0xd7   :  { %v237_v57 = vadd.f32 %v236_v53, %v234_v52  ;;  %416 = vmatpush.msrb.mxu1 %v327_v42  ;;  %v258_v52 = vld [vmem:[%s1702_s3] sm:$0x1]  ;;  %v539_v42 = vld [vmem:[%s1703_s7 + $0xf8] sm:$0xff] }
  0xd8   :  { %585 = vmatpush.msrb.mxu3 %v539_v42  ;;  %v544_v42 = vld [vmem:[%s1703_s7 + $0x120] sm:$0xff] }
  0xd9   :  { %v238_v61 = vrot.slane %v237_v57, 4 }
  0xdb   :  { %v239_v1 = vadd.f32 %v238_v61, %v237_v57 }
  0xdd   :  { %v240_v5 = vrot.slane %v239_v1, 2 }
  0xdf   :  { %v241_v9 = vadd.f32 %v240_v5, %v239_v1 }
  0xe1   :  { %v242_v16 = vrot.slane %v241_v9, 1 }
  0xe3   :  { %v243_v20 = vadd.f32 %v242_v16, %v241_v9 }
  0xe5   :  { %v244_v25 = vmul.f32 %v243_v20, %v1137_v31 }
  0xe7   :  { %v246_v29 = vadd.f32 1e-05, %v244_v25 }
  0xe9   :  { %879 = vrsqrt.f32 %v246_v29  ;;  %vm253_vm2 = vweird.f32 %v246_v29 }
  0xef   :  { %v880_v43 = vpop.eup %879 }
  0xf0   :  { %v248_v44 = vmul.f32 %v880_v43, %v246_v29  ;;  %vm254_vm1 = vweird.f32 %v880_v43 }
  0xf1   :  { %vm255_vm3 = vmor %vm253_vm2, %vm254_vm1 }
  0xf2   :  { %v249_v45 = vmul.f32 %v880_v43, %v248_v44  ;;  %v538_v44 = vld [vmem:[%s1703_s7 + $0xf0] sm:$0xff] }
  0xf3   :  { %586 = vmatpush.msrb.mxu3 %v538_v44  ;;  %v511_v44 = vld [vmem:[%s1703_s7 + $0x18] sm:$0xff] }
  0xf4   :  { %v250_v46 = vmul.f32 0.5, %v249_v45 }
  0xf6   :  { %v251_v47 = vsub.f32 1.5, %v250_v46  ;;  %v537_v46 = vld [vmem:[%s1703_s7 + $0xe8] sm:$0xff] }
  0xf7   :  { %587 = vmatpush.msrb.mxu3 %v537_v46  ;;  %v543_v46 = vld [vmem:[%s1703_s7 + $0x118] sm:$0xff] }
  0xf8   :  { %v252_v49 = vmul.f32 %v880_v43, %v251_v47 }
  0xfa   :  { %v256_v50 = vsel %vm255_vm3, %v880_v43, %v252_v49 }
  0xfb   :  { %v257_v51 = vmul.f32 %v256_v50, %v245_v48  ;;  %v536_v50 = vld [vmem:[%s1703_s7 + $0xe0] sm:$0xff] }
  0xfc   :  { %588 = vmatpush.msrb.mxu3 %v536_v50  ;;  %v541_v50 = vld [vmem:[%s1703_s7 + $0x108] sm:$0xff] }
  0xfd   :  { %v259_v53 = vmul.f32 %v257_v51, %v1146_v35  ;;  %v262_v54 = vperm.slane %v257_v51, 0 }
  0xff   :  { %v260_v55 = vsub.f32 %v258_v52, %v259_v53  ;;  %v264_v56 = vmul.f32 %v262_v54, %v1127_v14  ;;  %v265_v57 = vmul.f32 %v262_v54, %v1125_v11  ;;  %v266_v58 = vmul.f32 %v262_v54, %v1129_v15 }
 0x100   :  { %v267_v59 = vmul.f32 %v262_v54, %v1134_v21  ;;  %v523_v54 = vld [vmem:[%s1703_s7 + $0x78] sm:$0xff] }
 0x101   :  { %v269_v60 = vperm.slane %v260_v55, 0  ;;  %v1347_v55 = vld [vmem:[%s1703_s7 + $0x178] sm:$0xff]  ;;  %556 = vmatpush.msrb.mxu2 %v523_v54 }
 0x102   :  { %614 = vmatpush.msra.mxu0 %v1347_v55 }
 0x103   :  { %v271_v61 = vadd.f32 %v269_v60, %v264_v56  ;;  %v272_v62 = vadd.f32 %v269_v60, %v265_v57  ;;  %v273_v63 = vadd.f32 %v269_v60, %v266_v58  ;;  %v274_v0 = vadd.f32 %v269_v60, %v267_v59  ;;  %v535_v56 = vld [vmem:[%s1703_s7 + $0xd8] sm:$0xff]  ;;  %v522_v59 = vld [vmem:[%s1703_s7 + $0x70] sm:$0xff] }
 0x104   :  { %v1359_v60 = vld [vmem:[%s1703_s7 + $0x170] sm:$0xff]  ;;  %589 = vmatpush.msrb.mxu3 %v535_v56  ;;  %557 = vmatpush.msrb.mxu2 %v522_v59 }
 0x105   :  { %v275_v1 = vmax.f32 %v271_v61, 0.0  ;;  %v276_v2 = vmax.f32 %v272_v62, 0.0  ;;  %v278_v3 = vmax.f32 %v274_v0, 0.0  ;;  %v277_v4 = vmax.f32 %v273_v63, 0.0  ;;  %v534_v61 = vld [vmem:[%s1703_s7 + $0xd0] sm:$0xff]  ;;  %615 = vmatpush.msra.mxu0 %v1359_v60  ;;  %v521_v0 = vld [vmem:[%s1703_s7 + $0x68] sm:$0xff] }
 0x106   :  { %590 = vmatpush.msrb.mxu3 %v534_v61  ;;  %558 = vmatpush.msrb.mxu2 %v521_v0 }
 0x107   :  { %282 = vst [vmem:[#allocation2 + $0x30] sm:$0xff] %v278_v3  ;;  %388 = vmatmul.f32.vlgmr.msrb.gmra.mxu0 %v275_v1 }
 0x108   :  { %279 = vst [vmem:[#allocation2 + $0x8] sm:$0xff] %v275_v1  ;;  %v1371_v1 = vld [vmem:[%s1703_s7 + $0x168] sm:$0xff] }
 0x109   :  { %280 = vst [vmem:[#allocation2 + $0x10] sm:$0xff] %v276_v2  ;;  %616 = vmatpush.msra.mxu0 %v1371_v1 }
 0x10a   :  { %281 = vst [vmem:[#allocation2 + $0x28] sm:$0xff] %v277_v4 }
 0x10e   :  { %v294_v7 = vld [vmem:[#allocation2 + $0x31] sm:$0xff] }
 0x10f   :  { %v283_v14 = vld [vmem:[#allocation2 + $0x7] sm:$0xff]  ;;  %391 = vmatmul.f32.gmra.mxu0 %v276_v2 }
 0x110   :  { %359 = vmatmul.f32.vlgmr.msra.gmra.mxu3 %v283_v14  ;;  %v291_v11 = vld [vmem:[#allocation2 + $0x9] sm:$0xff]  ;;  %v292_v21 = vld [vmem:[#allocation2 + $0x11] sm:$0xff]  ;;  %v1383_v14 = vld [vmem:[%s1703_s7 + $0x160] sm:$0xff] }
 0x111   :  { %417 = vmatmul.f32.vlgmr.msrb.gmra.mxu1 %v291_v11  ;;  %v284_v15 = vld [vmem:[#allocation2 + $0xf] sm:$0xff]  ;;  %v285_v35 = vld [vmem:[#allocation2 + $0x27] sm:$0xff]  ;;  %617 = vmatpush.msra.mxu0 %v1383_v14 }
 0x112   :  { %v293_v5 = vld [vmem:[#allocation2 + $0x29] sm:$0xff]  ;;  %v532_v11 = vld [vmem:[%s1703_s7 + $0xc0] sm:$0xff] }
 0x113   :  { %v286_v6 = vld [vmem:[#allocation2 + $0x2f] sm:$0xff] }
 0x114   :  { %v533_v2 = vld [vmem:[%s1703_s7 + $0xc8] sm:$0xff] }
 0x115   :  { %591 = vmatpush.msrb.mxu3 %v533_v2 }
 0x117   :  { %394 = vmatmul.f32.gmra.mxu0 %v277_v4  ;;  %v520_v4 = vld [vmem:[%s1703_s7 + $0x60] sm:$0xff]  ;;  %592 = vmatpush.msrb.mxu3 %v532_v11 }
 0x118   :  { %362 = vmatmul.f32.gmra.mxu3 %v284_v15  ;;  %559 = vmatpush.msrb.mxu2 %v520_v4 }
 0x119   :  { %420 = vmatmul.f32.gmra.mxu1 %v292_v21  ;;  %v519_v21 = vld [vmem:[%s1703_s7 + $0x58] sm:$0xff] }
 0x11a   :  { %560 = vmatpush.msrb.mxu2 %v519_v21 }
 0x11f   :  { %397 = vmatmul.f32.gmra.mxu0 %v278_v3 }
 0x120   :  { %365 = vmatmul.f32.gmra.mxu3 %v285_v35  ;;  %v1395_v35 = vld [vmem:[%s1703_s7 + $0x158] sm:$0xff] }
 0x121   :  { %423 = vmatmul.f32.gmra.mxu1 %v293_v5  ;;  %v531_v5 = vld [vmem:[%s1703_s7 + $0xb8] sm:$0xff]  ;;  %618 = vmatpush.msra.mxu0 %v1395_v35 }
 0x122   :  { %593 = vmatpush.msrb.mxu3 %v531_v5 }
 0x128   :  { %368 = vmatmul.f32.gmra.mxu3 %v286_v6 }
 0x129   :  { %426 = vmatmul.f32.gmra.mxu1 %v294_v7  ;;  %v518_v7 = vld [vmem:[%s1703_s7 + $0x50] sm:$0xff] }
 0x12a   :  { %561 = vmatpush.msrb.mxu2 %v518_v7 }
 0x184   :  { %v389_v8 = vpop.f32.mrf.mxu0 }
 0x18c   :  { %v392_v12 = vpop.f32.mrf.mxu0 }
 0x18e   :  { %v418_v9 = vpop.f32.mrf.mxu1 }
 0x193   :  { %v360_v10 = vpop.f32.mrf.mxu3 }
 0x194   :  { %v395_v17 = vpop.f32.mrf.mxu0  ;;  %v390_v22 = vadd.f32 %v389_v8, %v360_v10  ;;  %v1407_v8 = vld [vmem:[%s1703_s7 + $0x150] sm:$0xff] }
 0x195   :  { %619 = vmatpush.msra.mxu0 %v1407_v8 }
 0x196   :  { %v421_v13 = vpop.f32.mrf.mxu1  ;;  %v1308_v25 = vadd.f32 %v418_v9, %v390_v22  ;;  %v530_v9 = vld [vmem:[%s1703_s7 + $0xb0] sm:$0xff] }
 0x197   :  { %594 = vmatpush.msrb.mxu3 %v530_v9 }
 0x19b   :  { %v363_v16 = vpop.f32.mrf.mxu3 }
 0x19c   :  { %v393_v20 = vadd.f32 %v392_v12, %v363_v16  ;;  %v398_v27 = vpop.f32.mrf.mxu0  ;;  %v517_v12 = vld [vmem:[%s1703_s7 + $0x48] sm:$0xff] }
 0x19d   :  { %v529_v16 = vld [vmem:[%s1703_s7 + $0xa8] sm:$0xff]  ;;  %562 = vmatpush.msrb.mxu2 %v517_v12 }
 0x19e   :  { %v424_v18 = vpop.f32.mrf.mxu1  ;;  %v1306_v24 = vadd.f32 %v421_v13, %v393_v20  ;;  %v1419_v13 = vld [vmem:[%s1703_s7 + $0x148] sm:$0xff]  ;;  %595 = vmatpush.msrb.mxu3 %v529_v16  ;;  %v528_v20 = vld [vmem:[%s1703_s7 + $0xa0] sm:$0xff] }
 0x19f   :  { %620 = vmatpush.msra.mxu0 %v1419_v13 }
 0x1a0   :  { %v430_v29 = vadd.f32 %v1306_v24, %v1308_v25  ;;  %596 = vmatpush.msrb.mxu3 %v528_v20 }
 0x1a3   :  { %v366_v19 = vpop.f32.mrf.mxu3 }
 0x1a4   :  { %v396_v23 = vadd.f32 %v395_v17, %v366_v19  ;;  %v1431_v19 = vld [vmem:[%s1703_s7 + $0x140] sm:$0xff] }
 0x1a5   :  { %621 = vmatpush.msra.mxu0 %v1431_v19 }
 0x1a6   :  { %v1310_v26 = vadd.f32 %v424_v18, %v396_v23  ;;  %v427_v32 = vpop.f32.mrf.mxu1  ;;  %v516_v18 = vld [vmem:[%s1703_s7 + $0x40] sm:$0xff]  ;;  %v515_v23 = vld [vmem:[%s1703_s7 + $0x38] sm:$0xff] }
 0x1a7   :  { %563 = vmatpush.msrb.mxu2 %v516_v18 }
 0x1a8   :  { %v431_v33 = vadd.f32 %v430_v29, %v1310_v26 }
 0x1a9   :  { %564 = vmatpush.msrb.mxu2 %v515_v23 }
 0x1ab   :  { %v369_v28 = vpop.f32.mrf.mxu3 }
 0x1ac   :  { %v399_v30 = vadd.f32 %v398_v27, %v369_v28  ;;  %v1443_v27 = vld [vmem:[%s1703_s7 + $0x138] sm:$0xff] }
 0x1ad   :  { %v527_v28 = vld [vmem:[%s1703_s7 + $0x98] sm:$0xff]  ;;  %622 = vmatpush.msra.mxu0 %v1443_v27 }
 0x1ae   :  { %v1315_v34 = vadd.f32 %v427_v32, %v399_v30  ;;  %v514_v30 = vld [vmem:[%s1703_s7 + $0x30] sm:$0xff]  ;;  %597 = vmatpush.msrb.mxu3 %v527_v28 }
 0x1af   :  { %v546_v32 = vld [vmem:[%s1703_s7 + $0x130] sm:$0xff]  ;;  %565 = vmatpush.msrb.mxu2 %v514_v30 }
 0x1b0   :  { %v432_v36 = vadd.f32 %v431_v33, %v1315_v34  ;;  %v526_v33 = vld [vmem:[%s1703_s7 + $0x90] sm:$0xff]  ;;  %623 = vmatpush.msra.mxu0 %v546_v32 }
 0x1b1   :  { %598 = vmatpush.msrb.mxu3 %v526_v33 }
 0x1b2   :  { %v433_v37 = vrot.slane %v432_v36, 4 }
 0x1b4   :  { %v434_v38 = vadd.f32 %v433_v37, %v432_v36  ;;  %v513_v37 = vld [vmem:[%s1703_s7 + $0x28] sm:$0xff] }
 0x1b5   :  { %566 = vmatpush.msrb.mxu2 %v513_v37 }
 0x1b6   :  { %v435_v39 = vrot.slane %v434_v38, 2 }
 0x1b8   :  { %v436_v40 = vadd.f32 %v435_v39, %v434_v38  ;;  %v545_v38 = vld [vmem:[%s1703_s7 + $0x128] sm:$0xff] }
 0x1b9   :  { %v525_v39 = vld [vmem:[%s1703_s7 + $0x88] sm:$0xff]  ;;  %624 = vmatpush.msra.mxu0 %v545_v38 }
 0x1ba   :  { %v437_v41 = vrot.slane %v436_v40, 1  ;;  %599 = vmatpush.msrb.mxu3 %v525_v39 }
 0x1bb   :  { %625 = vmatpush.msra.mxu0 %v544_v42 }
 0x1bc   :  { %v438_v43 = vadd.f32 %v437_v41, %v436_v40  ;;  %v512_v41 = vld [vmem:[%s1703_s7 + $0x20] sm:$0xff] }
 0x1bd   :  { %567 = vmatpush.msrb.mxu2 %v512_v41  ;;  %626 = vmatpush.msra.mxu0 %v543_v46 }
 0x1be   :  { %v1325_v45 = vmul.f32 %v438_v43, %v1137_v31  ;;  %v524_v43 = vld [vmem:[%s1703_s7 + $0x80] sm:$0xff] }
 0x1bf   :  { %600 = vmatpush.msrb.mxu3 %v524_v43  ;;  %568 = vmatpush.msrb.mxu2 %v511_v44 }
 0x1c0   :  { %v440_v47 = vsub.f32 %v1308_v25, %v1325_v45  ;;  %v441_v48 = vsub.f32 %v1306_v24, %v1325_v45  ;;  %v442_v49 = vsub.f32 %v1310_v26, %v1325_v45  ;;  %v443_v51 = vsub.f32 %v1315_v34, %v1325_v45 }
 0x1c1   :  { %856 = vmatpush.msra.mxu3 %v1347_v55 }
 0x1c2   :  { %v444_v52 = vmul.f32 %v440_v47, %v440_v47  ;;  %v445_v53 = vmul.f32 %v441_v48, %v441_v48  ;;  %v446_v57 = vmul.f32 %v442_v49, %v442_v49  ;;  %v447_v62 = vmul.f32 %v443_v51, %v443_v51  ;;  %v510_v47 = vld [vmem:[%s1703_s7 + $0x10] sm:$0xff]  ;;  %v509_v49 = vld [vmem:[%s1703_s7 + $0x8] sm:$0xff]  ;;  %v508_v51 = vld [vmem:[%s1703_s7] sm:$0xff] }
 0x1c3   :  { %v542_v48 = vld [vmem:[%s1703_s7 + $0x110] sm:$0xff]  ;;  %569 = vmatpush.msrb.mxu2 %v510_v47  ;;  %857 = vmatpush.msra.mxu3 %v1359_v60 }
 0x1c4   :  { %v448_v58 = vadd.f32 %v445_v53, %v444_v52  ;;  %627 = vmatpush.msra.mxu0 %v542_v48  ;;  %v540_v52 = vld [vmem:[%s1703_s7 + $0x100] sm:$0xff] }
 0x1c5   :  { %570 = vmatpush.msrb.mxu2 %v509_v49  ;;  %858 = vmatpush.msra.mxu3 %v1371_v1 }
 0x1c6   :  { %v449_v63 = vadd.f32 %v448_v58, %v446_v57  ;;  %628 = vmatpush.msra.mxu0 %v541_v50  ;;  %v458_v58 = vld [vmem:[%s1704_s5] sm:$0x1] }
 0x1c7   :  { %571 = vmatpush.msrb.mxu2 %v508_v51  ;;  %859 = vmatpush.msra.mxu3 %v1383_v14 }
 0x1c8   :  { %v450_v3 = vadd.f32 %v449_v63, %v447_v62  ;;  %629 = vmatpush.msra.mxu0 %v540_v52  ;;  %v471_v62 = vld [vmem:[%s1705_s6] sm:$0x1] }
 0x1c9   :  { %860 = vmatpush.msra.mxu3 %v1395_v35 }
 0x1ca   :  { %v451_v15 = vrot.slane %v450_v3, 4 }
 0x1cb   :  { %861 = vmatpush.msra.mxu3 %v1407_v8 }
 0x1cc   :  { %v452_v6 = vadd.f32 %v451_v15, %v450_v3 }
 0x1cd   :  { %862 = vmatpush.msra.mxu3 %v1419_v13 }
 0x1ce   :  { %v453_v10 = vrot.slane %v452_v6, 2 }
 0x1cf   :  { %863 = vmatpush.msra.mxu3 %v1431_v19 }
 0x1d0   :  { %v454_v17 = vadd.f32 %v453_v10, %v452_v6 }
 0x1d1   :  { %864 = vmatpush.msra.mxu3 %v1443_v27 }
 0x1d2   :  { %v455_v22 = vrot.slane %v454_v17, 1 }
 0x1d3   :  { %865 = vmatpush.msra.mxu3 %v546_v32 }
 0x1d4   :  { %v456_v29 = vadd.f32 %v455_v22, %v454_v17 }
 0x1d5   :  { %866 = vmatpush.msra.mxu3 %v545_v38 }
 0x1d6   :  { %v457_v36 = vmul.f32 %v456_v29, %v1137_v31 }
 0x1d7   :  { %867 = vmatpush.msra.mxu3 %v544_v42 }
 0x1d8   :  { %v459_v40 = vadd.f32 1e-05, %v457_v36 }
 0x1d9   :  { %868 = vmatpush.msra.mxu3 %v543_v46 }
 0x1da   :  { %881 = vrsqrt.f32 %v459_v40  ;;  %vm466_vm5 = vweird.f32 %v459_v40 }
 0x1db   :  { %869 = vmatpush.msra.mxu3 %v542_v48 }
 0x1dd   :  { %870 = vmatpush.msra.mxu3 %v541_v50 }
 0x1df   :  { %871 = vmatpush.msra.mxu3 %v540_v52 }
 0x1e0   :  { %v882_v53 = vpop.eup %881 }
 0x1e1   :  { %v461_v54 = vmul.f32 %v882_v53, %v459_v40  ;;  %vm467_vm4 = vweird.f32 %v882_v53 }
 0x1e2   :  { %vm468_vm6 = vmor %vm466_vm5, %vm467_vm4 }
 0x1e3   :  { %v462_v55 = vmul.f32 %v882_v53, %v461_v54 }
 0x1e5   :  { %v463_v56 = vmul.f32 0.5, %v462_v55 }
 0x1e7   :  { %v464_v57 = vsub.f32 1.5, %v463_v56 }
 0x1e9   :  { %v465_v59 = vmul.f32 %v882_v53, %v464_v57 }
 0x1eb   :  { %v469_v60 = vsel %vm468_vm6, %v882_v53, %v465_v59 }
 0x1ec   :  { %v470_v61 = vmul.f32 %v469_v60, %v458_v58 }
 0x1ee   :  { %v472_v63 = vmul.f32 %v470_v61, %v1325_v45  ;;  %v475_v0 = vperm.slane %v470_v61, 0 }
 0x1f0   :  { %v473_v1 = vsub.f32 %v471_v62, %v472_v63  ;;  %v477_v2 = vmul.f32 %v475_v0, %v1308_v25  ;;  %v478_v3 = vmul.f32 %v475_v0, %v1306_v24  ;;  %v479_v4 = vmul.f32 %v475_v0, %v1310_v26 }
 0x1f1   :  { %v480_v14 = vmul.f32 %v475_v0, %v1315_v34 }
 0x1f2   :  { %v482_v11 = vperm.slane %v473_v1, 0 }
 0x1f4   :  { %v484_v15 = vadd.f32 %v482_v11, %v477_v2  ;;  %v485_v21 = vadd.f32 %v482_v11, %v478_v3  ;;  %v486_v35 = vadd.f32 %v482_v11, %v479_v4  ;;  %v487_v5 = vadd.f32 %v482_v11, %v480_v14  ;;  %v743_v3 = vld [vmem:[%s1707_s10 + $0x78] sm:$0xff]  ;;  %v742_v14 = vld [vmem:[%s1707_s10 + $0x70] sm:$0xff] }
 0x1f5   :  { %753 = vmatpush.msra.mxu1 %v743_v3 }
 0x1f6   :  { %v488_v45 = vmax.f32 %v484_v15, 0.0  ;;  %v489_v6 = vmax.f32 %v485_v21, 0.0  ;;  %v490_v7 = vmax.f32 %v486_v35, 0.0  ;;  %v491_v8 = vmax.f32 %v487_v5, 0.0  ;;  %v741_v15 = vld [vmem:[%s1707_s10 + $0x68] sm:$0xff]  ;;  %v740_v35 = vld [vmem:[%s1707_s10 + $0x60] sm:$0xff] }
 0x1f7   :  { %754 = vmatpush.msra.mxu1 %v742_v14 }
 0x1f8   :  { %492 = vst [vmem:[#allocation2 + $0x8] sm:$0xff] %v488_v45  ;;  %601 = vmatmul.f32.vlgmr.msrb.gmra.mxu3 %v488_v45  ;;  %v739_v45 = vld [vmem:[%s1707_s10 + $0x58] sm:$0xff] }
 0x1f9   :  { %493 = vst [vmem:[#allocation2 + $0x10] sm:$0xff] %v489_v6  ;;  %755 = vmatpush.msra.mxu1 %v741_v15 }
 0x1fa   :  { %494 = vst [vmem:[#allocation2 + $0x28] sm:$0xff] %v490_v7 }
 0x1fb   :  { %495 = vst [vmem:[#allocation2 + $0x30] sm:$0xff] %v491_v8  ;;  %756 = vmatpush.msra.mxu1 %v740_v35  ;;  %v778_v35 = vld [vmem:[%s1709_s12 + $0x20] sm:$0xff] }
 0x1fd   :  { %757 = vmatpush.msra.mxu1 %v739_v45 }
 0x1ff   :  { %v496_v24 = vld [vmem:[#allocation2 + $0x7] sm:$0xff] }
 0x200   :  { %572 = vmatmul.f32.vlgmr.msrb.gmra.mxu2 %v496_v24  ;;  %v504_v25 = vld [vmem:[#allocation2 + $0x9] sm:$0xff]  ;;  %604 = vmatmul.f32.gmra.mxu3 %v489_v6  ;;  %v505_v34 = vld [vmem:[#allocation2 + $0x11] sm:$0xff] }
 0x201   :  { %630 = vmatmul.f32.vlgmr.msra.gmra.mxu0 %v504_v25  ;;  %v497_v26 = vld [vmem:[#allocation2 + $0xf] sm:$0xff]  ;;  %v498_v9 = vld [vmem:[#allocation2 + $0x27] sm:$0xff] }
 0x202   :  { %v499_v10 = vld [vmem:[#allocation2 + $0x2f] sm:$0xff]  ;;  %v736_v25 = vld [vmem:[%s1707_s10 + $0x40] sm:$0xff] }
 0x203   :  { %v506_v12 = vld [vmem:[#allocation2 + $0x29] sm:$0xff]  ;;  %v507_v13 = vld [vmem:[#allocation2 + $0x31] sm:$0xff] }
 0x204   :  { %v737_v24 = vld [vmem:[%s1707_s10 + $0x48] sm:$0xff] }
 0x208   :  { %575 = vmatmul.f32.gmra.mxu2 %v497_v26  ;;  %607 = vmatmul.f32.gmra.mxu3 %v490_v7  ;;  %v738_v7 = vld [vmem:[%s1707_s10 + $0x50] sm:$0xff] }
 0x209   :  { %633 = vmatmul.f32.gmra.mxu0 %v505_v34  ;;  %758 = vmatpush.msra.mxu1 %v738_v7  ;;  %v734_v26 = vld [vmem:[%s1707_s10 + $0x30] sm:$0xff]  ;;  %v733_v34 = vld [vmem:[%s1707_s10 + $0x28] sm:$0xff]  ;;  %v777_v7 = vld [vmem:[%s1709_s12 + $0x18] sm:$0xff] }
 0x20b   :  { %759 = vmatpush.msra.mxu1 %v737_v24 }
 0x20d   :  { %760 = vmatpush.msra.mxu1 %v736_v25  ;;  %v776_v25 = vld [vmem:[%s1709_s12 + $0x10] sm:$0xff] }
 0x210   :  { %578 = vmatmul.f32.gmra.mxu2 %v498_v9  ;;  %610 = vmatmul.f32.gmra.mxu3 %v491_v8 }
 0x218   :  { %581 = vmatmul.f32.gmra.mxu2 %v499_v10  ;;  %636 = vmatmul.f32.vlgmr.msra.gmra.mxu3 %v506_v12  ;;  %v732_v10 = vld [vmem:[%s1707_s10 + $0x20] sm:$0xff] }
 0x220   :  { %639 = vmatmul.f32.gmra.mxu3 %v507_v13  ;;  %v731_v13 = vld [vmem:[%s1707_s10 + $0x18] sm:$0xff] }
 0x27b   :  { %v602_v16 = vpop.f32.mrf.mxu3 }
 0x27e   :  { %v631_v22 = vpop.f32.mrf.mxu0 }
 0x283   :  { %v573_v17 = vpop.f32.mrf.mxu2  ;;  %v605_v18 = vpop.f32.mrf.mxu3 }
 0x284   :  { %v603_v30 = vadd.f32 %v602_v16, %v573_v17  ;;  %v730_v17 = vld [vmem:[%s1707_s10 + $0x10] sm:$0xff] }
 0x286   :  { %v634_v32 = vpop.f32.mrf.mxu0  ;;  %v1523_v38 = vadd.f32 %v631_v22, %v603_v30  ;;  %v728_v22 = vld [vmem:[%s1707_s10] sm:$0xff]  ;;  %v893_v30 = vmov 16.0  }
 0x28b   :  { %v576_v19 = vpop.f32.mrf.mxu2  ;;  %v608_v20 = vpop.f32.mrf.mxu3 }
 0x28c   :  { %v606_v28 = vadd.f32 %v605_v18, %v576_v19  ;;  %v729_v19 = vld [vmem:[%s1707_s10 + $0x8] sm:$0xff] }
 0x28e   :  { %v1521_v33 = vadd.f32 %v634_v32, %v606_v28  ;;  %v789_v28 = vld [vmem:[%s1709_s12 + $0x78] sm:$0xff] }
 0x28f   :  { %794 = vmatpush.msra.mxu2 %v789_v28 }
 0x290   :  { %v643_v41 = vadd.f32 %v1521_v33, %v1523_v38 }
 0x293   :  { %v611_v23 = vpop.f32.mrf.mxu3  ;;  %v579_v27 = vpop.f32.mrf.mxu2 }
 0x294   :  { %v609_v36 = vadd.f32 %v608_v20, %v579_v27 }
 0x29b   :  { %v637_v29 = vpop.f32.mrf.mxu3  ;;  %v582_v37 = vpop.f32.mrf.mxu2 }
 0x29c   :  { %v1525_v39 = vadd.f32 %v637_v29, %v609_v36  ;;  %v612_v40 = vadd.f32 %v611_v23, %v582_v37  ;;  %v671_v23 = vld [vmem:[%s1708_s8] sm:$0x1]  ;;  %v788_v29 = vld [vmem:[%s1709_s12 + $0x70] sm:$0xff]  ;;  %v787_v36 = vld [vmem:[%s1709_s12 + $0x68] sm:$0xff] }
 0x29d   :  { %795 = vmatpush.msra.mxu2 %v788_v29 }
 0x29e   :  { %v644_v43 = vadd.f32 %v643_v41, %v1525_v39  ;;  %v786_v41 = vld [vmem:[%s1709_s12 + $0x60] sm:$0xff] }
 0x29f   :  { %796 = vmatpush.msra.mxu2 %v787_v36 }
 0x2a1   :  { %797 = vmatpush.msra.mxu2 %v786_v41 }
 0x2a3   :  { %v640_v42 = vpop.f32.mrf.mxu3 }
 0x2a4   :  { %v1530_v44 = vadd.f32 %v640_v42, %v612_v40  ;;  %v684_v40 = vld [vmem:[%s1710_s9] sm:$0x1] }
 0x2a6   :  { %v645_v46 = vadd.f32 %v644_v43, %v1530_v44 }
 0x2a8   :  { %v646_v47 = vrot.slane %v645_v46, 4 }
 0x2aa   :  { %v647_v48 = vadd.f32 %v646_v47, %v645_v46  ;;  %v785_v46 = vld [vmem:[%s1709_s12 + $0x58] sm:$0xff] }
 0x2ab   :  { %798 = vmatpush.msra.mxu2 %v785_v46 }
 0x2ac   :  { %v648_v49 = vrot.slane %v647_v48, 2 }
 0x2ae   :  { %v649_v50 = vadd.f32 %v648_v49, %v647_v48 }
 0x2b0   :  { %v650_v51 = vrot.slane %v649_v50, 1 }
 0x2b2   :  { %v651_v52 = vadd.f32 %v650_v51, %v649_v50  ;;  %v784_v50 = vld [vmem:[%s1709_s12 + $0x50] sm:$0xff] }
 0x2b3   :  { %799 = vmatpush.msra.mxu2 %v784_v50 }
 0x2b4   :  { %v1534_v53 = vmul.f32 %v651_v52, %v1137_v31 }
 0x2b6   :  { %v653_v54 = vsub.f32 %v1523_v38, %v1534_v53  ;;  %v654_v55 = vsub.f32 %v1521_v33, %v1534_v53  ;;  %v655_v56 = vsub.f32 %v1525_v39, %v1534_v53  ;;  %v656_v57 = vsub.f32 %v1530_v44, %v1534_v53 }
 0x2b8   :  { %v657_v58 = vmul.f32 %v653_v54, %v653_v54  ;;  %v658_v59 = vmul.f32 %v654_v55, %v654_v55  ;;  %v659_v60 = vmul.f32 %v655_v56, %v655_v56  ;;  %v660_v62 = vmul.f32 %v656_v57, %v656_v57  ;;  %v783_v56 = vld [vmem:[%s1709_s12 + $0x48] sm:$0xff] }
 0x2b9   :  { %800 = vmatpush.msra.mxu2 %v783_v56 }
 0x2ba   :  { %v661_v61 = vadd.f32 %v658_v59, %v657_v58 }
 0x2bc   :  { %v662_v63 = vadd.f32 %v661_v61, %v659_v60 }
 0x2be   :  { %v663_v0 = vadd.f32 %v662_v63, %v660_v62  ;;  %v781_v63 = vld [vmem:[%s1709_s12 + $0x38] sm:$0xff] }
 0x2c0   :  { %v664_v1 = vrot.slane %v663_v0, 4 }
 0x2c2   :  { %v665_v2 = vadd.f32 %v664_v1, %v663_v0 }
 0x2c4   :  { %v666_v4 = vrot.slane %v665_v2, 2 }
 0x2c6   :  { %v667_v11 = vadd.f32 %v666_v4, %v665_v2  ;;  %v780_v2 = vld [vmem:[%s1709_s12 + $0x30] sm:$0xff] }
 0x2c8   :  { %v668_v21 = vrot.slane %v667_v11, 1 }
 0x2ca   :  { %v669_v5 = vadd.f32 %v668_v21, %v667_v11  ;;  %v779_v11 = vld [vmem:[%s1709_s12 + $0x28] sm:$0xff] }
 0x2cc   :  { %v670_v6 = vmul.f32 %v669_v5, %v1137_v31  ;;  %v735_v31 = vld [vmem:[%s1707_s10 + $0x38] sm:$0xff] }
 0x2cd   :  { %761 = vmatpush.msra.mxu1 %v735_v31 }
 0x2ce   :  { %v672_v8 = vadd.f32 1e-05, %v670_v6 }
 0x2cf   :  { %762 = vmatpush.msra.mxu1 %v734_v26 }
 0x2d0   :  { %883 = vrsqrt.f32 %v672_v8  ;;  %vm679_vm8 = vweird.f32 %v672_v8 }
 0x2d1   :  { %763 = vmatpush.msra.mxu1 %v733_v34  ;;  %885 = vrcp.f32 %v893_v30 }
 0x2d3   :  { %764 = vmatpush.msra.mxu1 %v732_v10 }
 0x2d5   :  { %765 = vmatpush.msra.mxu1 %v731_v13 }
 0x2d6   :  { %v884_v9 = vpop.eup %883 }
 0x2d7   :  { %v674_v12 = vmul.f32 %v884_v9, %v672_v8  ;;  %vm680_vm7 = vweird.f32 %v884_v9  ;;  %766 = vmatpush.msra.mxu1 %v730_v17  ;;  %v886_v47 = vpop.eup %885  ;;  %v775_v17 = vld [vmem:[%s1709_s12 + $0x8] sm:$0xff] }
 0x2d8   :  { %vm681_vm9 = vmor %vm679_vm8, %vm680_vm7  ;;  %v720_v55 = vmul.f32 16.0, %v886_v47  ;;  %vm724_vm10 = vweird.f32 %v886_v47 }
 0x2d9   :  { %v675_v16 = vmul.f32 %v884_v9, %v674_v12  ;;  %767 = vmatpush.msra.mxu1 %v729_v19  ;;  %v875_v19 = vld [vmem:[%s1706_s11] ss:$0 sm:$0xff] }
 0x2da   :  { %v721_v62 = vsub.f32 1.0, %v720_v55 }
 0x2db   :  { %v676_v18 = vmul.f32 0.5, %v675_v16  ;;  %768 = vmatpush.msra.mxu1 %v728_v22 }
 0x2dc   :  { %v722_v14 = vmul.f32 %v886_v47, %v721_v62 }
 0x2dd   :  { %v677_v20 = vsub.f32 1.5, %v676_v18  ;;  %v774_v18 = vld [vmem:[%s1709_s12] sm:$0xff] }
 0x2de   :  { %v723_v6 = vadd.f32 %v886_v47, %v722_v14 }
 0x2df   :  { %v678_v27 = vmul.f32 %v884_v9, %v677_v20 }
 0x2e0   :  { %v725_v34 = vsel %vm724_vm10, %v886_v47, %v723_v6 }
 0x2e1   :  { %v682_v32 = vsel %vm681_vm9, %v884_v9, %v678_v27  ;;  %v876_v27 = vld [vmem:[%s1711_s13] ss:$0 sm:$0xff] }
 0x2e2   :  { %v683_v37 = vmul.f32 %v682_v32, %v671_v23 }
 0x2e4   :  { %v685_v42 = vmul.f32 %v683_v37, %v1534_v53  ;;  %v688_v43 = vperm.slane %v683_v37, 0 }
 0x2e6   :  { %v686_v48 = vsub.f32 %v684_v40, %v685_v42  ;;  %v692_v49 = vmul.f32 %v688_v43, %v1525_v39  ;;  %v693_v51 = vmul.f32 %v688_v43, %v1530_v44  ;;  %v690_v53 = vmul.f32 %v688_v43, %v1523_v38  ;;  %v782_v38 = vld [vmem:[%s1709_s12 + $0x40] sm:$0xff] }
 0x2e7   :  { %v691_v54 = vmul.f32 %v688_v43, %v1521_v33  ;;  %801 = vmatpush.msra.mxu2 %v782_v38 }
 0x2e8   :  { %v695_v52 = vperm.slane %v686_v48, 0 }
 0x2e9   :  { %802 = vmatpush.msra.mxu2 %v781_v63 }
 0x2ea   :  { %v1625_v57 = vadd.f32 %v695_v52, %v692_v49  ;;  %v1627_v39 = vadd.f32 %v695_v52, %v693_v51  ;;  %v1629_v58 = vadd.f32 %v695_v52, %v690_v53  ;;  %v1631_v59 = vadd.f32 %v695_v52, %v691_v54 }
 0x2eb   :  { %803 = vmatpush.msra.mxu2 %v780_v2 }
 0x2ec   :  { %v703_v33 = vmax.f32 %v1625_v57, 0.0  ;;  %v704_v44 = vmax.f32 %v1627_v39, 0.0  ;;  %v701_v60 = vmax.f32 %v1629_v58, 0.0  ;;  %v702_v61 = vmax.f32 %v1631_v59, 0.0 }
 0x2ed   :  { %804 = vmatpush.msra.mxu2 %v779_v11 }
 0x2ee   :  { %v712_v0 = vadd.f32 %v704_v44, %v703_v33  ;;  %v705_v1 = vadd.f32 %v702_v61, %v701_v60 }
 0x2ef   :  { %805 = vmatpush.msra.mxu2 %v778_v35 }
 0x2f0   :  { %v713_v3 = vrot.slane %v712_v0, 4  ;;  %v706_v4 = vrot.slane %v705_v1, 4 }
 0x2f1   :  { %806 = vmatpush.msra.mxu2 %v777_v7 }
 0x2f2   :  { %v714_v15 = vadd.f32 %v713_v3, %v712_v0  ;;  %v707_v21 = vadd.f32 %v706_v4, %v705_v1 }
 0x2f3   :  { %807 = vmatpush.msra.mxu2 %v776_v25 }
 0x2f4   :  { %v715_v5 = vrot.slane %v714_v15, 2  ;;  %v708_v45 = vrot.slane %v707_v21, 2 }
 0x2f5   :  { %808 = vmatpush.msra.mxu2 %v775_v17 }
 0x2f6   :  { %v709_v8 = vadd.f32 %v708_v45, %v707_v21  ;;  %v716_v24 = vadd.f32 %v715_v5, %v714_v15 }
 0x2f7   :  { %809 = vmatpush.msra.mxu2 %v774_v18 }
 0x2f8   :  { %v710_v31 = vrot.slane %v709_v8, 1  ;;  %v717_v26 = vrot.slane %v716_v24, 1 }
 0x2fa   :  { %v711_v9 = vadd.f32 %v710_v31, %v709_v8  ;;  %v718_v10 = vadd.f32 %v717_v26, %v716_v24 }
 0x2fc   :  { %v726_v12 = vmul.f32 %v725_v34, %v711_v9  ;;  %v727_v13 = vmul.f32 %v725_v34, %v718_v10 }
 0x2fe   :  { %v751_v16 = vsel %vm750_vm11, %v727_v13, %v726_v12 }
 0x2ff   :  { %769 = vmatmul.f32.vlgmr.msra.gmra.mxu1 %v751_v16 }
 0x37c   :  { %v770_v20 = vpop.f32.mrf.mxu1 }
 0x37d   :  { %v771_v22 = vadd.f32 %v875_v19, %v770_v20 }
 0x37f   :  { %v773_v23 = vmax.f32 %v771_v22, 0.0 }
 0x381   :  { %810 = vmatmul.f32.vlgmr.msra.gmra.mxu2 %v773_v23 }
 0x404   :  { %v811_v28 = vpop.f32.mrf.mxu2 }
 0x405   :  { %v812_v29 = vadd.f32 %v876_v27, %v811_v28 }
 0x407   :  { %v855_v30 = vmul.f32 -1.442695, %v812_v29 }
 0x409   :  { %887 = vpow2.f32 %v855_v30 }
 0x40f   :  { %v888_v32 = vpop.eup %887 }
 0x410   :  { %v817_v36 = vadd.f32 1.0, %v888_v32 }
 0x412   :  { %889 = vrcp.f32 %v817_v36  ;;  %v829_v42 = vand.u32 2147483648, %v817_v36  ;;  %v827_v46 = vand.u32 2147483647, %v817_v36  ;;  %vm823_vm13 = vweird.f32 %v817_v36 }
 0x414   :  { %v830_v48 = vor.u32 1.1754944e-38, %v829_v42  ;;  %vm828_vm15 = vcmp.eq.f32.partialorder %v827_v46, 8.507059e+37 }
 0x418   :  { %v890_v37 = vpop.eup %889 }
 0x419   :  { %v819_v40 = vmul.f32 %v890_v37, %v817_v36  ;;  %vm824_vm12 = vweird.f32 %v890_v37 }
 0x41a   :  { %vm825_vm14 = vmor %vm823_vm13, %vm824_vm12 }
 0x41b   :  { %v820_v41 = vsub.f32 1.0, %v819_v40 }
 0x41d   :  { %v821_v43 = vmul.f32 %v890_v37, %v820_v41 }
 0x41f   :  { %v822_v47 = vadd.f32 %v890_v37, %v821_v43 }
 0x421   :  { %v826_v49 = vsel %vm825_vm14, %v890_v37, %v822_v47 }
 0x422   :  { %v831_v50 = vsel %vm828_vm15, %v830_v48, %v826_v49 }
 0x423   :  { %v834_v51 = vrot.slane %v831_v50, 1  ;;  %v835_v52 = vperm.slane %v831_v50, 0 }
 0x425   :  { %v836_v53 = vperm.slane %v834_v51, 0  ;;  %v839_v54 = vmul.f32 %v835_v52, %v701_v60  ;;  %v840_v55 = vmul.f32 %v835_v52, %v702_v61 }
 0x427   :  { %v841_v56 = vmul.f32 %v836_v53, %v703_v33  ;;  %v842_v38 = vmul.f32 %v836_v53, %v704_v44  ;;  %v843_v62 = vmax.f32 %v839_v54, 0.0  ;;  %v844_v63 = vmax.f32 %v840_v55, 0.0 }
 0x429   :  { %v845_v0 = vmax.f32 %v841_v56, 0.0  ;;  %v846_v1 = vmax.f32 %v842_v38, 0.0  ;;  %847 = vst [vmem:[%s1712_s14] sm:$0xff] %v843_v62 }
 0x42a   :  { %848 = vst [vmem:[%s1712_s14 + $0x8] sm:$0xff] %v844_v63 }
 0x42b   :  { %849 = vst [vmem:[%s1712_s14 + $0x10] sm:$0xff] %v845_v0 }
 0x42c   :  { %850 = vst [vmem:[%s1712_s14 + $0x18] sm:$0xff] %v846_v1 }

</bundles_post_ra>
